<compile_context>
chip_gen: v6e
topology: v6e:2x2x1
jax: 0.10.0
libtpu: 0.0.40
codegen_flags: <defaults>
</compile_context>

<pallas_src>
import functools

import jax
import jax.numpy as jnp
import numpy as np
from jax.experimental import pallas as pl
from jax.experimental.pallas import tpu as pltpu


def _upsample_conv_kernel(xp_ref, w_ref, b_ref, out_ref, *, th, w_img, cin,
                          row_align):
    """One batch element, one H-tile: fused nearest-2x upsample + 3x3 conv.

    xp_ref : (H+2, W+2, Cin)   zero-padded ORIGINAL image (batch dim squeezed)
    w_ref  : (9*Cin, 4*Cout)   phase-collapsed weights; rows = (dy, dx, ci),
                               cols = (row-parity a, col-parity b, co)
    b_ref  : (1, 4*Cout)       f32 bias tiled over the 4 parities
    out_ref: (TH*W, 4*Cout)    RAW matmul-layout output tile; the wrapper's single
                               NCHW transpose does all parity de-interleaving.
    """
    hi = pl.program_id(1)
    row0 = hi * th
    if row_align >= 8:                       # only state power-of-two alignment
        row0 = pl.multiple_of(row0, row_align)

    # Halo window of the padded original image: rows [row0, row0 + TH + 2).
    xwin = xp_ref[pl.ds(row0, th + 2), :, :]             # (TH+2, W+2, Cin)

    # im2col: 9 shifted taps concatenated along lanes -> (TH, W, 9*Cin); the final
    # reshape only merges the two MAJOR dims (free when W % 8 == 0).
    # TODO(synk): for large Cin, split over dy (3 accumulated dots, K = 3*Cin) to
    #             cap this VMEM temporary at 1/3 (matters on v7x's 64 MiB VMEM).
    taps = [xwin[dy:dy + th, dx:dx + w_img, :]
            for dy in range(3) for dx in range(3)]
    t = jnp.concatenate(taps, axis=-1).reshape(th * w_img, 9 * cin)

    # Single MXU pass per tile; f32 accumulate + f32 bias, one downcast at store.
    y = jnp.dot(t, w_ref[...], preferred_element_type=jnp.float32) + b_ref[...]
    out_ref[...] = y.astype(out_ref.dtype)


def _polyphase_weights(w_oihw, bias, operand_dtype):
    """Fold the nearest-2x upsample into the 3x3 conv weights (one-time, tiny)."""
    cout, cin = int(w_oihw.shape[0]), int(w_oihw.shape[1])
    w_hwio = jnp.transpose(w_oihw, (2, 3, 1, 0)).astype(jnp.float32)   # (3,3,Ci,Co)
    # m[a, d, k] = 1 iff padded-ORIGINAL tap offset d (for output parity a) sums
    # kernel row/col k once the nearest-2x upsample is folded into the conv.
    m = jnp.array([[[1, 0, 0], [0, 1, 1], [0, 0, 0]],    # parity 0
                   [[0, 0, 0], [1, 1, 0], [0, 0, 1]]],   # parity 1
                  dtype=jnp.float32)
    # weff[a, b, dy, dx, ci, co]: weight of padded-input tap (p+dy, q+dx) for the
    # output pixel (2p+a, 2q+b).
    weff = jnp.einsum('ayY,bxX,YXio->abyxio', m, m, w_hwio)    # (2,2,3,3,Ci,Co)
    # Fused layout: rows = (dy, dx, ci) = im2col K axis; cols = (a, b, co).
    wbig = weff.transpose(2, 3, 4, 0, 1, 5).reshape(9 * cin, 4 * cout)
    bias4 = jnp.tile(bias.astype(jnp.float32).reshape(-1), 4).reshape(1, 4 * cout)
    return wbig.astype(operand_dtype), bias4


def _vmem_estimate(th, h, w, cin, cout, itemsize):
    inp = 2 * (h + 2) * (w + 2) * cin * itemsize          # resident image, 2 bufs
    wgt = 2 * (9 * cin * 4 * cout * itemsize + 4 * cout * 4)
    outb = 2 * th * w * 4 * cout * itemsize                # pipelined output tile
    tmp = th * w * 9 * cin * itemsize + th * w * 4 * cout * 4   # im2col + acc
    return inp + wgt + outb + tmp


def _pick_tile_h(n, h, w, cin, cout, itemsize, requested=None):
    """Largest TH that divides H, keeps (TH*W) 8-aligned and fits the VMEM budget."""
    valid = [d for d in range(1, h + 1)
             if h % d == 0 and (d == h or (d * w) % 8 == 0)]
    budget = 24 * 1024 * 1024           # conservative: fits v7x's 64 MiB physical
    cands = [d for d in valid
             if _vmem_estimate(d, h, w, cin, cout, itemsize) <= budget]
    cands = cands or [valid[0]]
    if requested is not None:
        pref = [d for d in cands if d <= int(requested)]
        cands = pref or cands
    th = max(cands)
    # v7x has 2 TensorCores: keep >= 2 parallel grid steps when the batch is 1.
    if n == 1 and th == h:
        smaller = [d for d in cands if d < h]
        if smaller:
            th = max(smaller)
    return th


def upsample_forward(x_nchw, w_oihw=None, bias=None, *, use_conv=True,
                     tile_h=None):
    """Pallas implementation of Upsample.forward (NCHW in -> NCHW out)."""
    n, c, h, w = x_nchw.shape
    if not use_conv:
        # Pure nearest-neighbour 2x upsample: data movement only; nothing to fuse.
        return jnp.repeat(jnp.repeat(x_nchw, 2, axis=2), 2, axis=3)

    assert w_oihw is not None and bias is not None
    assert w_oihw.shape[1] == c and tuple(w_oihw.shape[2:]) == (3, 3)
    cout = int(w_oihw.shape[0])

    # One small layout pass over the ORIGINAL input (NCHW->NHWC + 1px zero pad,
    # fused by XLA); this is ~1/4 the size of the output.  The upsampled tensor
    # never exists in HBM.
    xp = jnp.pad(jnp.transpose(x_nchw, (0, 2, 3, 1)),
                 ((0, 0), (1, 1), (1, 1), (0, 0)))

    wbig, bias4 = _polyphase_weights(w_oihw, bias, x_nchw.dtype)

    itemsize = jnp.dtype(x_nchw.dtype).itemsize
    th = _pick_tile_h(n, h, w, c, cout, itemsize, tile_h)
    grid = (n, h // th)
    row_align = th & (-th)                  # largest power of two dividing TH

    # Output minor dim 4*Cout is lane-dense (>=128) for realistic channel counts;
    # tiny-C configs (like the demo) fall back to masked stores but are
    # overhead-bound regardless.
    vmem_limit = int(min(56 * 2**20,
                         max(32 * 2**20,
                             2 * _vmem_estimate(th, h, w, c, cout, itemsize))))

    kernel = functools.partial(_upsample_conv_kernel, th=th, w_img=w, cin=c,
                               row_align=row_align)

    out_flat = pl.pallas_call(
        kernel,
        out_shape=jax.ShapeDtypeStruct((n, h * w, 4 * cout), x_nchw.dtype),
        grid=grid,
        in_specs=[
            # Whole padded image per batch element: its block index is constant
            # along the H-tile axis, so it is DMA'd once per batch element.
            pl.BlockSpec((None, h + 2, w + 2, c), lambda ni, hi: (ni, 0, 0, 0)),
            pl.BlockSpec((9 * c, 4 * cout), lambda ni, hi: (0, 0)),
            pl.BlockSpec((1, 4 * cout), lambda ni, hi: (0, 0)),
        ],
        out_specs=pl.BlockSpec((None, th * w, 4 * cout),
                               lambda ni, hi: (ni, hi, 0)),
        compiler_params=pltpu.CompilerParams(
            dimension_semantics=("parallel", "parallel"),
            vmem_limit_bytes=vmem_limit),
    )(xp, wbig, bias4)

    # Single layout pass: split (pixel, parity-pair) axes and de-interleave the
    # parities while converting to the module's NCHW convention.
    # out[n, co, 2p+a, 2q+b] = y[n, p, q, a, b, co]
    # TODO(synk): drop this transpose if the surrounding model can consume the
    #             folded layout / NHWC directly.
    y6 = out_flat.reshape(n, h, w, 2, 2, cout)
    out = jnp.transpose(y6, (0, 5, 1, 3, 2, 4)).reshape(n, cout, 2 * h, 2 * w)
    return out


def reference_forward(x_nchw, w_oihw, bias):
    """Pure-JAX reference mirroring the PyTorch module (NCHW conv)."""
    up = jnp.repeat(jnp.repeat(x_nchw, 2, axis=2), 2, axis=3)
    y = jax.lax.conv_general_dilated(
        up, w_oihw,
        window_strides=(1, 1),
        padding=((1, 1), (1, 1)),
        dimension_numbers=("NCHW", "OIHW", "NCHW"),
    )
    return y + bias.reshape(1, -1, 1, 1)


if __name__ == "__main__":
    # Module config: channels=4, use_conv=True, out_channel defaults to channels.
    N, C, H, W = 2, 4, 16, 16
    Cout = C

    key = jax.random.PRNGKey(0)
    kx, kw, kb = jax.random.split(key, 3)
    x = jax.random.normal(kx, (N, C, H, W), dtype=jnp.float32)
    w_oihw = jax.random.normal(kw, (Cout, C, 3, 3), dtype=jnp.float32) * 0.1
    bias = jax.random.normal(kb, (Cout,), dtype=jnp.float32) * 0.1

    ref = jax.block_until_ready(reference_forward(x, w_oihw, bias))

    # Default tiling (TH = H -> grid (N, 1)).
    out = jax.block_until_ready(upsample_forward(x, w_oihw, bias, use_conv=True))
    assert out.shape == (N, Cout, 2 * H, 2 * W), out.shape
    np.testing.assert_allclose(np.asarray(out), np.asarray(ref),
                               rtol=1e-5, atol=2e-5)

    # Forced smaller H-tiles to exercise the dynamic halo-slice path (grid (N, 2)).
    out_t = jax.block_until_ready(
        upsample_forward(x, w_oihw, bias, use_conv=True, tile_h=8))
    np.testing.assert_allclose(np.asarray(out_t), np.asarray(ref),
                               rtol=1e-5, atol=2e-5)

    # use_conv=False branch (pure nearest upsample).
    out_nc = jax.block_until_ready(upsample_forward(x, use_conv=False))
    assert out_nc.shape == (N, C, 2 * H, 2 * W)
    np.testing.assert_allclose(
        np.asarray(out_nc),
        np.asarray(jnp.repeat(jnp.repeat(x, 2, axis=2), 2, axis=3)))

    print("KERNEL_OK")
</pallas_src>

<mosaic_0001>
module attributes {stable_mosaic.version = 11 : i64} {
  func.func @_upsample_conv_kernel(%arg0: i32, %arg1: i32, %arg2: memref<1x18x18x4xf32, #tpu.memory_space<vmem>>, %arg3: memref<36x16xf32, #tpu.memory_space<vmem>>, %arg4: memref<1x16xf32, #tpu.memory_space<vmem>>, %arg5: memref<1x256x16xf32, #tpu.memory_space<vmem>>) attributes {dimension_semantics = [#tpu.dimension_semantics<parallel>, #tpu.dimension_semantics<parallel>], iteration_bounds = array<i64: 2, 1>, scalar_prefetch = 0 : i64, scratch_operands = 0 : i64, tpu.core_type = #tpu.core_type<tc>, window_params = [{transform_indices = @transform_0, window_bounds = array<i64: 1, 18, 18, 4>}, {pipeline_mode = #tpu.pipeline_mode<synchronous>, transform_indices = @transform_1, window_bounds = array<i64: 36, 16>}, {pipeline_mode = #tpu.pipeline_mode<synchronous>, transform_indices = @transform_2, window_bounds = array<i64: 1, 16>}, {transform_indices = @transform_3, window_bounds = array<i64: 1, 256, 16>}]} {
    %c16_i32 = arith.constant 16 : i32
    %0 = arith.muli %arg1, %c16_i32 : i32
    %1 = tpu.assume_multiple %0, 16 : i32
    %c0 = arith.constant 0 : index
    %2 = arith.index_cast %1 : i32 to index
    %c0_0 = arith.constant 0 : index
    %c0_1 = arith.constant 0 : index
    %3 = vector.load %arg2[%c0, %2, %c0_0, %c0_1] : memref<1x18x18x4xf32, #tpu.memory_space<vmem>>, vector<1x18x18x4xf32>
    %4 = vector.shape_cast %3 : vector<1x18x18x4xf32> to vector<18x18x4xf32>
    %5 = vector.extract_strided_slice %4 {offsets = [0, 0, 0], sizes = [16, 16, 4], strides = [1, 1, 1]} : vector<18x18x4xf32> to vector<16x16x4xf32>
    %6 = vector.extract_strided_slice %4 {offsets = [0, 1, 0], sizes = [16, 16, 4], strides = [1, 1, 1]} : vector<18x18x4xf32> to vector<16x16x4xf32>
    %7 = vector.extract_strided_slice %4 {offsets = [0, 2, 0], sizes = [16, 16, 4], strides = [1, 1, 1]} : vector<18x18x4xf32> to vector<16x16x4xf32>
    %8 = vector.extract_strided_slice %4 {offsets = [1, 0, 0], sizes = [16, 16, 4], strides = [1, 1, 1]} : vector<18x18x4xf32> to vector<16x16x4xf32>
    %9 = vector.extract_strided_slice %4 {offsets = [1, 1, 0], sizes = [16, 16, 4], strides = [1, 1, 1]} : vector<18x18x4xf32> to vector<16x16x4xf32>
    %10 = vector.extract_strided_slice %4 {offsets = [1, 2, 0], sizes = [16, 16, 4], strides = [1, 1, 1]} : vector<18x18x4xf32> to vector<16x16x4xf32>
    %11 = vector.extract_strided_slice %4 {offsets = [2, 0, 0], sizes = [16, 16, 4], strides = [1, 1, 1]} : vector<18x18x4xf32> to vector<16x16x4xf32>
    %12 = vector.extract_strided_slice %4 {offsets = [2, 1, 0], sizes = [16, 16, 4], strides = [1, 1, 1]} : vector<18x18x4xf32> to vector<16x16x4xf32>
    %13 = vector.extract_strided_slice %4 {offsets = [2, 2, 0], sizes = [16, 16, 4], strides = [1, 1, 1]} : vector<18x18x4xf32> to vector<16x16x4xf32>
    %14 = tpu.concatenate %5, %6, %7, %8, %9, %10, %11, %12, %13 in 2 : vector<16x16x4xf32>, vector<16x16x4xf32>, vector<16x16x4xf32>, vector<16x16x4xf32>, vector<16x16x4xf32>, vector<16x16x4xf32>, vector<16x16x4xf32>, vector<16x16x4xf32>, vector<16x16x4xf32> -> vector<16x16x36xf32>
    %15 = vector.shape_cast %14 : vector<16x16x36xf32> to vector<256x36xf32>
    %c0_2 = arith.constant 0 : index
    %c0_3 = arith.constant 0 : index
    %16 = vector.load %arg3[%c0_2, %c0_3] : memref<36x16xf32, #tpu.memory_space<vmem>>, vector<36x16xf32>
    %cst = arith.constant dense<0.000000e+00> : vector<256x16xf32>
    %17 = tpu.matmul %15, %16, %cst {dimension_numbers = #tpu.dot_dimension_numbers<[1], [0], [0], [1], [0, 0, 1, 1], [], []>} : vector<256x36xf32>, vector<36x16xf32>, vector<256x16xf32> -> vector<256x16xf32>
    %c0_4 = arith.constant 0 : index
    %c0_5 = arith.constant 0 : index
    %18 = vector.load %arg4[%c0_4, %c0_5] : memref<1x16xf32, #tpu.memory_space<vmem>>, vector<1x16xf32>
    %19 = vector.broadcast %18 : vector<1x16xf32> to vector<256x16xf32>
    %20 = arith.addf %17, %19 : vector<256x16xf32>
    %c0_6 = arith.constant 0 : index
    %c0_7 = arith.constant 0 : index
    %c0_8 = arith.constant 0 : index
    %21 = vector.load %arg5[%c0_6, %c0_7, %c0_8] : memref<1x256x16xf32, #tpu.memory_space<vmem>>, vector<1x256x16xf32>
    %22 = vector.shape_cast %21 : vector<1x256x16xf32> to vector<256x16xf32>
    %23 = vector.shape_cast %20 : vector<256x16xf32> to vector<1x256x16xf32>
    tpu.vector_store %arg5[%c0_6, %c0_7, %c0_8], %23 {strides = array<i32>} : memref<1x256x16xf32, #tpu.memory_space<vmem>>, vector<1x256x16xf32>,
    return
  }
  func.func @transform_0(%arg0: i32, %arg1: i32) -> (i32, i32, i32, i32) {
    %c0_i32 = arith.constant 0 : i32
    %c0_i32_0 = arith.constant 0 : i32
    %c0_i32_1 = arith.constant 0 : i32
    %c0_i32_2 = arith.constant 0 : i32
    return %arg0, %c0_i32, %c0_i32_0, %c0_i32_1 : i32, i32, i32, i32
  }
  func.func @transform_1(%arg0: i32, %arg1: i32) -> (i32, i32) {
    %c0_i32 = arith.constant 0 : i32
    %c0_i32_0 = arith.constant 0 : i32
    %c0_i32_1 = arith.constant 0 : i32
    return %c0_i32, %c0_i32_0 : i32, i32
  }
  func.func @transform_2(%arg0: i32, %arg1: i32) -> (i32, i32) {
    %c0_i32 = arith.constant 0 : i32
    %c0_i32_0 = arith.constant 0 : i32
    %c0_i32_1 = arith.constant 0 : i32
    return %c0_i32, %c0_i32_0 : i32, i32
  }
  func.func @transform_3(%arg0: i32, %arg1: i32) -> (i32, i32, i32) {
    %c0_i32 = arith.constant 0 : i32
    %c0_i32_0 = arith.constant 0 : i32
    return %arg0, %arg1, %c0_i32 : i32, i32, i32
  }
}

</mosaic_0001>

<bundles_post_ra>
// kernel: tpu_custom_call.1
= control target key start
LH: loop header
LB: loop body
LE: loop exit
PB: predicated region body
PF: predicated region fallthrough
CT: control target
= control target key end

     0   :  { %s2227_s12 = smov 0   ;;  %s2229_s13 = smov 0   ;;  %s4046_s0 = inlined_call_operand.vmem [shape: f32[2,18,18,4], index: 0, kind: input, shape index: {}]   ;;  %s4047_s1 = inlined_call_operand.vmem [shape: f32[36,16], index: 1, kind: input, shape index: {}]   ;;  %s4048_s2 = inlined_call_operand.vmem [shape: f32[1,16], index: 2, kind: input, shape index: {}]   ;;  %s4049_s3 = inlined_call_operand.vmem [shape: f32[2,256,16], index: 3, kind: output, shape index: {}]  }
   0x1   :  { %s2231_s14 = smov 0  }
   0x2 LB: > { %s25_s15 = sadd.s32 1, %s2193_s13  ;;  %p1976_p0 = scmp.ge.s32.totalorder %s2197_s14, 1  ;;  %s2197_s14 = sphi %s2231_s14, %s13_s14   ;;  %s2193_s13 = sphi %s2229_s13, %s4331_s13   ;;  %s2189_s12 = sphi %s2227_s12, %s4330_s12  }
   0x3   : > { %p27_p1 = scmp.ge.s32.totalorder %s25_s15, 2  ;;  %p151_p2 = scmp.lt.s32.totalorder %s2197_s14, 3 }
   0x5   : > { %s4333_s15 = smov (%p27_p1, %s25_s15), 0  ;;  %p152_p3 = pnand %p1976_p0, %p151_p2 }
   0x7   : > { %155 = sbr.rel (%p152_p3) target bundleno = 845 (0x34d), region = 32 }
   0xc   : > { %p179_p4 = scmp.lt.s32.totalorder %s2189_s12, 1  ;;  %vm299_vm0 = vcmask 1046528   ;;  %s2199_s20 = smov 4   ;;  %vm476_vm1 = vcmask 1045504   ;;  %vm1255_vm2 = vcmask 31744   ;;  %vm1288_vm3 = vcmask 64512  }
   0xd   : > { %s2200_s21 = smov 8   ;;  %s2201_s22 = smov 12   ;;  %vm1628_vm4 = vcmask 1043456   ;;  %vm1321_vm5 = vcmask 97280   ;;  %vm1354_vm6 = vcmask 130048   ;;  %vm1387_vm7 = vcmask 162816  }
   0xe   : > { %s4335_s12 = smov (!%p179_p4, %s2189_s12), 1  ;;  %s2202_s23 = smov 16   ;;  %vm1420_vm8 = vcmask 195584   ;;  %vm1453_vm9 = vcmask 228352   ;;  %vm1486_vm10 = vcmask 261120   ;;  %vm1531_vm11 = vcmask 293888  }
   0xf   : > { %s2122_s16 = smul.u32 432, %s4335_s12  ;;  %s2203_s24 = smov 20  }
  0x10   : > { %s2204_s25 = smov 24   ;;  %s2205_s30 = smov 28  }
  0x11   : > { %s2251_s19 = scalar_lea.vmem %s4046_s0, %s2122_s16  ;;  %s2206_s10 = smov 32  }
  0x12   : > { %v2254_v0 = vld [vmem:[%s2251_s19 + $0x18] sm:$0xff]  ;;  %v2257_v1 = vld [vmem:[%s2251_s19 + $0x20] sm:$0xff]  ;;  %v2265_v5 = vld [vmem:[%s2251_s19 + $0x8] sm:$0xff]  ;;  %s2016_s11 = sshll.u32 %s4335_s12, 8 }
  0x13   : > { %v2260_v2 = vld [vmem:[%s2251_s19] sm:$0xff]  ;;  %v305_v3 = vrot.slane %v2254_v0, 1  ;;  %v306_v4 = vrot.slane %v2257_v1, 1  ;;  %v2269_v7 = vld [vmem:[%s2251_s19 + $0x28] sm:$0x3]  ;;  %v301_v8 = vrot.slane %v2265_v5, 1 }
  0x14   : > { %v300_v6 = vrot.slane %v2260_v2, 1  ;;  %v308_v9 = vrot.slane %v2269_v7, 1  ;;  %v2274_v10 = vld [vmem:[%s2251_s19 + $0x10] sm:$0x3]  ;;  %v2277_v11 = vld [vmem:[%s2251_s19 + $0x38] sm:$0xff]  ;;  %v2307_v24 = vld [vmem:[%s2251_s19 + $0x48] sm:$0xff] }
  0x15   : > { %4158 = vst [vmem:[#allocation2_spill] sm:$0xff] %v2277_v11  ;;  %v2280_v12 = vsel %vm299_vm0, %v305_v3, %v306_v4  ;;  %v303_v13 = vrot.slane %v2274_v10, 1  ;;  %v2284_v14 = vld [vmem:[%s2251_s19 + $0x40] sm:$0x3]  ;;  %v2287_v15 = vld [vmem:[%s2251_s19 + $0x30] sm:$0xff]  ;;  %v311_v18 = vrot.slane %v2277_v11, 1 }
  0x16   : > { %384 = vrot.lane.b32.xlu1 %v2280_v12, %s2199_s20  ;;  %v302_v16 = vsel %vm299_vm0, %v300_v6, %v301_v8  ;;  %v2294_v17 = vsel %vm299_vm0, %v306_v4, %v308_v9  ;;  %v313_v19 = vrot.slane %v2284_v14, 1  ;;  %v310_v21 = vrot.slane %v2287_v15, 1  ;;  %v2301_v22 = vld [vmem:[%s2251_s19 + $0x50] sm:$0xff]  ;;  %v2304_v23 = vld [vmem:[%s2251_s19 + $0x58] sm:$0x3]  ;;  %v2322_v30 = vld [vmem:[%s2251_s19 + $0x68] sm:$0xff] }
  0x17   : > { %380 = vrot.lane.b32.xlu0 %v302_v16, %s2199_s20  ;;  %v304_v20 = vsel %vm299_vm0, %v301_v8, %v303_v13  ;;  %v316_v26 = vrot.slane %v2301_v22, 1  ;;  %v318_v27 = vrot.slane %v2304_v23, 1  ;;  %v315_v29 = vrot.slane %v2307_v24, 1  ;;  %v2325_v31 = vld [vmem:[%s2251_s19 + $0x70] sm:$0x3]  ;;  %v2328_v32 = vld [vmem:[%s2251_s19 + $0x60] sm:$0xff] }
  0x18   : > { %v2313_v25 = vsel %vm299_vm0, %v311_v18, %v313_v19  ;;  %v2318_v28 = vsel %vm299_vm0, %v310_v21, %v311_v18  ;;  %v321_v34 = vrot.slane %v2322_v30, 1  ;;  %v323_v35 = vrot.slane %v2325_v31, 1  ;;  %v2344_v38 = vld [vmem:[%s2251_s19 + $0x80] sm:$0xff]  ;;  %v2347_v39 = vld [vmem:[%s2251_s19 + $0x88] sm:$0x3]  ;;  %v2350_v40 = vld [vmem:[%s2251_s19 + $0x78] sm:$0xff] }
  0x19   : > { %v2335_v33 = vsel %vm299_vm0, %v316_v26, %v318_v27  ;;  %v2340_v36 = vsel %vm299_vm0, %v315_v29, %v316_v26  ;;  %v320_v37 = vrot.slane %v2328_v32, 1  ;;  %v326_v42 = vrot.slane %v2344_v38, 1  ;;  %v2366_v46 = vld [vmem:[%s2251_s19 + $0x98] sm:$0xff]  ;;  %v2369_v47 = vld [vmem:[%s2251_s19 + $0xa0] sm:$0x3]  ;;  %v2372_v48 = vld [vmem:[%s2251_s19 + $0x90] sm:$0xff] }
  0x1a   : > { %386 = vrot.lane.b32.xlu1 %v2294_v17, %s2199_s20  ;;  %4159 = vst [vmem:[#allocation3_spill] sm:$0xff] %v2340_v36  ;;  %v2357_v41 = vsel %vm299_vm0, %v321_v34, %v323_v35  ;;  %v328_v43 = vrot.slane %v2347_v39, 1  ;;  %v325_v45 = vrot.slane %v2350_v40, 1  ;;  %v331_v50 = vrot.slane %v2366_v46, 1  ;;  %v2388_v54 = vld [vmem:[%s2251_s19 + $0xb0] sm:$0xff]  ;;  %v2394_v56 = vld [vmem:[%s2251_s19 + $0xa8] sm:$0xff] }
  0x1b   : > { %382 = vrot.lane.b32.xlu0 %v304_v20, %s2199_s20  ;;  %4160 = vst [vmem:[#allocation4_spill] sm:$0xff] %v2357_v41  ;;  %v2362_v44 = vsel %vm299_vm0, %v320_v37, %v321_v34  ;;  %v333_v51 = vrot.slane %v2369_v47, 1  ;;  %v330_v53 = vrot.slane %v2372_v48, 1  ;;  %v2391_v55 = vld [vmem:[%s2251_s19 + $0xb8] sm:$0x3]  ;;  %v336_v58 = vrot.slane %v2388_v54, 1 }
  0x1c   : > { %4161 = vst [vmem:[#allocation5_spill] sm:$0xff] %v2362_v44  ;;  %v2379_v49 = vsel %vm299_vm0, %v326_v42, %v328_v43  ;;  %v2384_v52 = vsel %vm299_vm0, %v325_v45, %v326_v42  ;;  %v338_v59 = vrot.slane %v2391_v55, 1  ;;  %v335_v61 = vrot.slane %v2394_v56, 1  ;;  %v2410_v62 = vld [vmem:[%s2251_s19 + $0xc8] sm:$0xff]  ;;  %v2413_v63 = vld [vmem:[%s2251_s19 + $0xd0] sm:$0x3] }
  0x1d   : > { %4162 = vst [vmem:[#allocation6_spill] sm:$0xff] %v2379_v49  ;;  %4163 = vst [vmem:[#allocation7_spill] sm:$0xff] %v2384_v52  ;;  %v2401_v57 = vsel %vm299_vm0, %v331_v50, %v333_v51  ;;  %v2406_v60 = vsel %vm299_vm0, %v330_v53, %v331_v50  ;;  %v2416_v3 = vld [vmem:[%s2251_s19 + $0xc0] sm:$0xff]  ;;  %v341_v6 = vrot.slane %v2410_v62, 1  ;;  %v343_v8 = vrot.slane %v2413_v63, 1  ;;  %v2438_v19 = vld [vmem:[%s2251_s19 + $0xd8] sm:$0xff] }
  0x1e   : > { %390 = vrot.lane.b32.xlu1 %v2313_v25, %s2199_s20  ;;  %4164 = vst [vmem:[#allocation8_spill] sm:$0xff] %v2401_v57  ;;  %4165 = vst [vmem:[#allocation9_spill] sm:$0xff] %v2406_v60  ;;  %v2423_v4 = vsel %vm299_vm0, %v336_v58, %v338_v59  ;;  %v2428_v9 = vsel %vm299_vm0, %v335_v61, %v336_v58  ;;  %v340_v13 = vrot.slane %v2416_v3, 1  ;;  %v2432_v16 = vld [vmem:[%s2251_s19 + $0xe0] sm:$0xff]  ;;  %v2435_v18 = vld [vmem:[%s2251_s19 + $0xe8] sm:$0x3] }
  0x1f   : > { %388 = vrot.lane.b32.xlu0 %v2318_v28, %s2199_s20  ;;  %4166 = vst [vmem:[#allocation10_spill] sm:$0xff] %v2423_v4  ;;  %4167 = vst [vmem:[#allocation11_spill] sm:$0xff] %v2428_v9  ;;  %v2445_v20 = vsel %vm299_vm0, %v341_v6, %v343_v8  ;;  %v346_v21 = vrot.slane %v2432_v16, 1  ;;  %v348_v26 = vrot.slane %v2435_v18, 1  ;;  %v345_v29 = vrot.slane %v2438_v19, 1  ;;  %v2454_v34 = vld [vmem:[%s2251_s19 + $0xf8] sm:$0xff] }
  0x20   : > { %4168 = vst [vmem:[#allocation12_spill] sm:$0xff] %v2445_v20  ;;  %v2450_v27 = vsel %vm299_vm0, %v340_v13, %v341_v6  ;;  %v2457_v35 = vld [vmem:[%s2251_s19 + $0x100] sm:$0x3]  ;;  %v2460_v37 = vld [vmem:[%s2251_s19 + $0xf0] sm:$0xff]  ;;  %v351_v43 = vrot.slane %v2454_v34, 1  ;;  %v2482_v59 = vld [vmem:[%s2251_s19 + $0x108] sm:$0xff] }
  0x21   : > { %4169 = vst [vmem:[#allocation13_spill] sm:$0xff] %v2450_v27  ;;  %v2467_v42 = vsel %vm299_vm0, %v346_v21, %v348_v26  ;;  %v353_v45 = vrot.slane %v2457_v35, 1  ;;  %v2472_v50 = vsel %vm299_vm0, %v345_v29, %v346_v21  ;;  %v350_v51 = vrot.slane %v2460_v37, 1  ;;  %v2476_v53 = vld [vmem:[%s2251_s19 + $0x110] sm:$0xff]  ;;  %v2479_v58 = vld [vmem:[%s2251_s19 + $0x118] sm:$0x3] }
  0x22   : > { %394 = vrot.lane.b32.xlu1 %v2335_v33, %s2199_s20  ;;  %4170 = vst [vmem:[#allocation14_spill] sm:$0xff] %v2467_v42  ;;  %4171 = vst [vmem:[#allocation15_spill] sm:$0xff] %v2472_v50  ;;  %v356_v6 = vrot.slane %v2476_v53, 1  ;;  %v358_v8 = vrot.slane %v2479_v58, 1  ;;  %v355_v21 = vrot.slane %v2482_v59, 1  ;;  %v2498_v26 = vld [vmem:[%s2251_s19 + $0x128] sm:$0xff] }
  0x23   : > { %392 = vrot.lane.b32.xlu0 %v2340_v36, %s2199_s20  ;;  %v2489_v61 = vsel %vm299_vm0, %v351_v43, %v353_v45  ;;  %v2494_v13 = vsel %vm299_vm0, %v350_v51, %v351_v43  ;;  %v2501_v29 = vld [vmem:[%s2251_s19 + $0x130] sm:$0x3]  ;;  %v361_v43 = vrot.slane %v2498_v26, 1 }
  0x24   : > { %4172 = vst [vmem:[#allocation16_spill] sm:$0xff] %v2489_v61  ;;  %4173 = vst [vmem:[#allocation17_spill] sm:$0xff] %v2494_v13  ;;  %v2511_v45 = vsel %vm299_vm0, %v356_v6, %v358_v8  ;;  %v363_v51 = vrot.slane %v2501_v29, 1 }
  0x25   : > { %4174 = vst [vmem:[#allocation18_spill] sm:$0xff] %v2511_v45 }
  0x26   : > { %398 = vrot.lane.b32.xlu1 %v2357_v41, %s2199_s20  ;;  %v2533_v8 = vsel %vm299_vm0, %v361_v43, %v363_v51 }
  0x27   : > { %396 = vrot.lane.b32.xlu0 %v2362_v44, %s2199_s20  ;;  %4176 = vst [vmem:[#allocation20_spill] sm:$0xff] %v2533_v8  ;;  %v2567_v44 = vld [vmem:[%s2251_s19 + $0x178] sm:$0x3] }
  0x2a   : > { %402 = vrot.lane.b32.xlu1 %v2379_v49, %s2199_s20  ;;  %v2564_v49 = vld [vmem:[%s2251_s19 + $0x170] sm:$0xff] }
  0x2b   : > { %400 = vrot.lane.b32.xlu0 %v2384_v52, %s2199_s20 }
  0x2e   : > { %406 = vrot.lane.b32.xlu1 %v2401_v57, %s2199_s20 }
  0x2f   : > { %404 = vrot.lane.b32.xlu0 %v2406_v60, %s2199_s20  ;;  %v2542_v60 = vld [vmem:[%s2251_s19 + $0x158] sm:$0xff] }
  0x32   : > { %410 = vrot.lane.b32.xlu1 %v2423_v4, %s2199_s20 }
  0x33   : > { %408 = vrot.lane.b32.xlu0 %v2428_v9, %s2199_s20 }
  0x36   : > { %414 = vrot.lane.b32.xlu1 %v2445_v20, %s2199_s20  ;;  %v2520_v20 = vld [vmem:[%s2251_s19 + $0x140] sm:$0xff] }
  0x37   : > { %412 = vrot.lane.b32.xlu0 %v2450_v27, %s2199_s20 }
  0x3a   : > { %418 = vrot.lane.b32.xlu1 %v2467_v42, %s2199_s20  ;;  %v2516_v42 = vsel %vm299_vm0, %v355_v21, %v356_v6  ;;  %v366_v6 = vrot.slane %v2520_v20, 1 }
  0x3b   : > { %416 = vrot.lane.b32.xlu0 %v2472_v50, %s2199_s20  ;;  %v2504_v50 = vld [vmem:[%s2251_s19 + $0x120] sm:$0xff]  ;;  %4175 = vst [vmem:[#allocation19_spill] sm:$0xff] %v2516_v42 }
  0x3c   : > { %v360_v27 = vrot.slane %v2504_v50, 1 }
  0x3e   : > { %422 = vrot.lane.b32.xlu1 %v2489_v61, %s2199_s20  ;;  %v2523_v61 = vld [vmem:[%s2251_s19 + $0x148] sm:$0x3]  ;;  %v2538_v9 = vsel %vm299_vm0, %v360_v27, %v361_v43  ;;  %v371_v27 = vrot.slane %v2542_v60, 1 }
  0x3f   : > { %420 = vrot.lane.b32.xlu0 %v2494_v13, %s2199_s20  ;;  %v2526_v13 = vld [vmem:[%s2251_s19 + $0x138] sm:$0xff]  ;;  %v368_v21 = vrot.slane %v2523_v61, 1  ;;  %4177 = vst [vmem:[#allocation21_spill] sm:$0xff] %v2538_v9 }
  0x40   : > { %v365_v4 = vrot.slane %v2526_v13, 1 }
  0x41   : > { %v2555_v51 = vsel %vm299_vm0, %v366_v6, %v368_v21 }
  0x42   : > { %426 = vrot.lane.b32.xlu1 %v2511_v45, %s2199_s20  ;;  %v2545_v45 = vld [vmem:[%s2251_s19 + $0x160] sm:$0x3]  ;;  %4178 = vst [vmem:[#allocation22_spill] sm:$0xff] %v2555_v51  ;;  %v2560_v57 = vsel %vm299_vm0, %v365_v4, %v366_v6  ;;  %v376_v4 = vrot.slane %v2564_v49, 1  ;;  %v378_v6 = vrot.slane %v2567_v44, 1 }
  0x43   : > { %424 = vrot.lane.b32.xlu0 %v2516_v42, %s2199_s20  ;;  %v2548_v42 = vld [vmem:[%s2251_s19 + $0x150] sm:$0xff]  ;;  %v373_v43 = vrot.slane %v2545_v45, 1  ;;  %4179 = vst [vmem:[#allocation23_spill] sm:$0xff] %v2560_v57 }
  0x44   : > { %v370_v52 = vrot.slane %v2548_v42, 1 }
  0x45   : > { %v2577_v21 = vsel %vm299_vm0, %v371_v27, %v373_v43  ;;  %v478_v43 = vrot.slane %v2265_v5, 2  ;;  %v485_v5 = vrot.slane %v2269_v7, 2  ;;  %v487_v7 = vrot.slane %v2287_v15, 2 }
  0x46   : > { %430 = vrot.lane.b32.xlu1 %v2533_v8, %s2199_s20  ;;  %v2570_v8 = vld [vmem:[%s2251_s19 + $0x168] sm:$0xff]  ;;  %4181 = vst [vmem:[#allocation25_spill] sm:$0xff] %v2577_v21 }
  0x47   : > { %428 = vrot.lane.b32.xlu0 %v2538_v9, %s2199_s20  ;;  %4180 = vst [vmem:[#allocation24_spill] sm:$0xff] %v2570_v8  ;;  %v2582_v9 = vsel %vm299_vm0, %v370_v52, %v371_v27  ;;  %v375_v41 = vrot.slane %v2570_v8, 1  ;;  %v477_v52 = vrot.slane %v2260_v2, 2 }
  0x48   : > { %4182 = vst [vmem:[#allocation26_spill] sm:$0xff] %v2582_v9 }
  0x49   : > { %v2595_v36 = vsel %vm299_vm0, %v375_v41, %v376_v4  ;;  %v482_v41 = vrot.slane %v2254_v0, 2 }
  0x4a   : > { %434 = vrot.lane.b32.xlu1 %v2555_v51, %s2199_s20  ;;  %v2590_v51 = vsel %vm299_vm0, %v376_v4, %v378_v6  ;;  %4184 = vst [vmem:[#allocation28_spill] sm:$0xff] %v2595_v36  ;;  %v483_v6 = vrot.slane %v2257_v1, 2  ;;  %v488_v4 = vrot.slane %v2277_v11, 2 }
  0x4b   : > { %432 = vrot.lane.b32.xlu0 %v2560_v57, %s2199_s20  ;;  %4183 = vst [vmem:[#allocation27_spill] sm:$0xff] %v2590_v51  ;;  %v480_v57 = vrot.slane %v2274_v10, 2  ;;  %v479_v10 = vsel %vm476_vm1, %v477_v52, %v478_v43  ;;  %v493_v52 = vrot.slane %v2301_v22, 2 }
  0x4c   : > { %v2610_v2 = vsel %vm476_vm1, %v483_v6, %v485_v5 }
  0x4d   : > { %v481_v27 = vsel %vm476_vm1, %v478_v43, %v480_v57  ;;  %v490_v57 = vrot.slane %v2284_v14, 2  ;;  %v2628_v14 = vsel %vm476_vm1, %v487_v7, %v488_v4  ;;  %v503_v7 = vrot.slane %v2344_v38, 2 }
  0x4e   : > { %438 = vrot.lane.b32.xlu1 %v2577_v21, %s2199_s20  ;;  %4186 = vst [vmem:[#allocation30_spill] sm:$0xff] %v2628_v14  ;;  %v515_v21 = vrot.slane %v2391_v55, 2 }
  0x4f   : > { %436 = vrot.lane.b32.xlu0 %v2582_v9, %s2199_s20  ;;  %v2623_v43 = vsel %vm476_vm1, %v488_v4, %v490_v57  ;;  %v497_v4 = vrot.slane %v2328_v32, 2  ;;  %v520_v9 = vrot.slane %v2413_v63, 2 }
  0x50   : > { %4185 = vst [vmem:[#allocation29_spill] sm:$0xff] %v2623_v43 }
  0x52   : > { %442 = vrot.lane.b32.xlu1 %v2590_v51, %s2199_s20  ;;  %v2615_v51 = vsel %vm476_vm1, %v482_v41, %v483_v6  ;;  %v492_v6 = vrot.slane %v2307_v24, 2  ;;  %v500_v41 = vrot.slane %v2325_v31, 2 }
  0x53   : > { %440 = vrot.lane.b32.xlu0 %v2595_v36, %s2199_s20  ;;  %v510_v36 = vrot.slane %v2369_v47, 2  ;;  %s3877_s20 = scalar_lea.vmem %s4049_s3, %s2016_s11 }
  0x56   : > { %559 = vrot.lane.b32.xlu1 %v481_v27, %s2200_s21  ;;  %v495_v27 = vrot.slane %v2304_v23, 2  ;;  %v2641_v23 = vsel %vm476_vm1, %v492_v6, %v493_v52 }
  0x57   : > { %557 = vrot.lane.b32.xlu0 %v479_v10, %s2200_s21  ;;  %v498_v10 = vrot.slane %v2322_v30, 2  ;;  %4188 = vst [vmem:[#allocation32_spill] sm:$0xff] %v2641_v23 }
  0x58   : > { %v2636_v5 = vsel %vm476_vm1, %v493_v52, %v495_v27  ;;  %v505_v27 = vrot.slane %v2347_v39, 2  ;;  %v502_v52 = vrot.slane %v2350_v40, 2 }
  0x59   : > { %4187 = vst [vmem:[#allocation31_spill] sm:$0xff] %v2636_v5  ;;  %v2649_v57 = vsel %vm476_vm1, %v498_v10, %v500_v41  ;;  %v2654_v31 = vsel %vm476_vm1, %v497_v4, %v498_v10  ;;  %v508_v41 = vrot.slane %v2366_v46, 2  ;;  %v507_v10 = vrot.slane %v2372_v48, 2 }
  0x5a   : > { %563 = vrot.lane.b32.xlu1 %v2610_v2, %s2200_s21  ;;  %4189 = vst [vmem:[#allocation33_spill] sm:$0xff] %v2649_v57  ;;  %4190 = vst [vmem:[#allocation34_spill] sm:$0xff] %v2654_v31  ;;  %v2662_v6 = vsel %vm476_vm1, %v503_v7, %v505_v27  ;;  %v2667_v39 = vsel %vm476_vm1, %v502_v52, %v503_v7  ;;  %v513_v27 = vrot.slane %v2388_v54, 2  ;;  %v512_v7 = vrot.slane %v2394_v56, 2 }
  0x5b   : > { %561 = vrot.lane.b32.xlu0 %v2615_v51, %s2200_s21  ;;  %4191 = vst [vmem:[#allocation35_spill] sm:$0xff] %v2662_v6  ;;  %4192 = vst [vmem:[#allocation36_spill] sm:$0xff] %v2667_v39  ;;  %v2675_v4 = vsel %vm476_vm1, %v508_v41, %v510_v36  ;;  %v2680_v47 = vsel %vm476_vm1, %v507_v10, %v508_v41  ;;  %v518_v36 = vrot.slane %v2410_v62, 2  ;;  %v517_v41 = vrot.slane %v2416_v3, 2 }
  0x5c   : > { %4193 = vst [vmem:[#allocation37_spill] sm:$0xff] %v2675_v4  ;;  %4194 = vst [vmem:[#allocation38_spill] sm:$0xff] %v2680_v47  ;;  %v2688_v52 = vsel %vm476_vm1, %v513_v27, %v515_v21  ;;  %v2693_v55 = vsel %vm476_vm1, %v512_v7, %v513_v27  ;;  %v523_v21 = vrot.slane %v2432_v16, 2  ;;  %v522_v27 = vrot.slane %v2438_v19, 2 }
  0x5d   : > { %4195 = vst [vmem:[#allocation39_spill] sm:$0xff] %v2688_v52  ;;  %4196 = vst [vmem:[#allocation40_spill] sm:$0xff] %v2693_v55  ;;  %v2701_v10 = vsel %vm476_vm1, %v518_v36, %v520_v9  ;;  %v2706_v63 = vsel %vm476_vm1, %v517_v41, %v518_v36  ;;  %v528_v9 = vrot.slane %v2454_v34, 2  ;;  %v527_v36 = vrot.slane %v2460_v37, 2 }
  0x5e   : > { %567 = vrot.lane.b32.xlu1 %v2623_v43, %s2200_s21  ;;  %4197 = vst [vmem:[#allocation41_spill] sm:$0xff] %v2701_v10  ;;  %4198 = vst [vmem:[#allocation42_spill] sm:$0xff] %v2706_v63 }
  0x5f   : > { %565 = vrot.lane.b32.xlu0 %v2628_v14, %s2200_s21 }
  0x62   : > { %571 = vrot.lane.b32.xlu1 %v2636_v5, %s2200_s21 }
  0x63   : > { %569 = vrot.lane.b32.xlu0 %v2641_v23, %s2200_s21 }
  0x66   : > { %575 = vrot.lane.b32.xlu1 %v2649_v57, %s2200_s21 }
  0x67   : > { %573 = vrot.lane.b32.xlu0 %v2654_v31, %s2200_s21 }
  0x6a   : > { %579 = vrot.lane.b32.xlu1 %v2662_v6, %s2200_s21 }
  0x6b   : > { %577 = vrot.lane.b32.xlu0 %v2667_v39, %s2200_s21 }
  0x6e   : > { %583 = vrot.lane.b32.xlu1 %v2675_v4, %s2200_s21  ;;  %v525_v4 = vrot.slane %v2435_v18, 2  ;;  %v2719_v18 = vsel %vm476_vm1, %v522_v27, %v523_v21 }
  0x6f   : > { %581 = vrot.lane.b32.xlu0 %v2680_v47, %s2200_s21  ;;  %v550_v47 = vrot.slane %v2545_v45, 2  ;;  %v553_v45 = vrot.slane %v2564_v49, 2 }
  0x70   : > { %v2714_v7 = vsel %vm476_vm1, %v523_v21, %v525_v4  ;;  %v533_v4 = vrot.slane %v2476_v53, 2  ;;  %v532_v21 = vrot.slane %v2482_v59, 2 }
  0x72   : > { %587 = vrot.lane.b32.xlu1 %v2688_v52, %s2200_s21  ;;  %v530_v52 = vrot.slane %v2457_v35, 2  ;;  %v2732_v35 = vsel %vm476_vm1, %v527_v36, %v528_v9 }
  0x73   : > { %585 = vrot.lane.b32.xlu0 %v2693_v55, %s2200_s21  ;;  %4200 = vst [vmem:[#allocation44_spill] sm:$0xff] %v2732_v35  ;;  %v545_v55 = vrot.slane %v2523_v61, 2 }
  0x74   : > { %v2727_v41 = vsel %vm476_vm1, %v528_v9, %v530_v52  ;;  %v538_v52 = vrot.slane %v2498_v26, 2  ;;  %v537_v9 = vrot.slane %v2504_v50, 2 }
  0x75   : > { %4199 = vst [vmem:[#allocation43_spill] sm:$0xff] %v2727_v41 }
  0x76   : > { %591 = vrot.lane.b32.xlu1 %v2701_v10, %s2200_s21  ;;  %v535_v10 = vrot.slane %v2479_v58, 2  ;;  %v2745_v58 = vsel %vm476_vm1, %v532_v21, %v533_v4 }
  0x77   : > { %589 = vrot.lane.b32.xlu0 %v2706_v63, %s2200_s21  ;;  %v540_v63 = vrot.slane %v2501_v29, 2  ;;  %4202 = vst [vmem:[#allocation46_spill] sm:$0xff] %v2745_v58  ;;  %v2758_v29 = vsel %vm476_vm1, %v537_v9, %v538_v52 }
  0x78   : > { %v2740_v27 = vsel %vm476_vm1, %v533_v4, %v535_v10  ;;  %v543_v10 = vrot.slane %v2520_v20, 2  ;;  %4204 = vst [vmem:[#allocation48_spill] sm:$0xff] %v2758_v29  ;;  %v542_v4 = vrot.slane %v2526_v13, 2 }
  0x79   : > { %4201 = vst [vmem:[#allocation45_spill] sm:$0xff] %v2740_v27  ;;  %v2753_v36 = vsel %vm476_vm1, %v538_v52, %v540_v63  ;;  %v548_v63 = vrot.slane %v2542_v60, 2  ;;  %v547_v52 = vrot.slane %v2548_v42, 2 }
  0x7a   : > { %595 = vrot.lane.b32.xlu1 %v2714_v7, %s2200_s21  ;;  %4203 = vst [vmem:[#allocation47_spill] sm:$0xff] %v2753_v36  ;;  %v2766_v21 = vsel %vm476_vm1, %v543_v10, %v545_v55  ;;  %v2773_v61 = vsel %vm476_vm1, %v542_v4, %v543_v10  ;;  %v552_v4 = vrot.slane %v2570_v8, 2 }
  0x7b   : > { %593 = vrot.lane.b32.xlu0 %v2719_v18, %s2200_s21  ;;  %4205 = vst [vmem:[#allocation49_spill] sm:$0xff] %v2766_v21  ;;  %4207 = vst [vmem:[#allocation51_spill] sm:$0xff] %v2773_v61  ;;  %v2783_v55 = vsel %vm476_vm1, %v548_v63, %v550_v47  ;;  %v2790_v10 = vsel %vm476_vm1, %v547_v52, %v548_v63 }
  0x7c   : > { %4209 = vst [vmem:[#allocation53_spill] sm:$0xff] %v2783_v55  ;;  %4211 = vst [vmem:[#allocation55_spill] sm:$0xff] %v2790_v10 }
  0x7e   : > { %599 = vrot.lane.b32.xlu1 %v2727_v41, %s2200_s21 }
  0x7f   : > { %597 = vrot.lane.b32.xlu0 %v2732_v35, %s2200_s21  ;;  %v2940_v35 = vld [vmem:[%s2251_s19 + $0x180] sm:$0xff] }
  0x80   : > { %4224 = vst [vmem:[#allocation68_spill] sm:$0xff] %v2940_v35 }
  0x82   : > { %603 = vrot.lane.b32.xlu1 %v2740_v27, %s2200_s21 }
  0x83   : > { %601 = vrot.lane.b32.xlu0 %v2745_v58, %s2200_s21 }
  0x86   : > { %607 = vrot.lane.b32.xlu1 %v2753_v36, %s2200_s21 }
  0x87   : > { %605 = vrot.lane.b32.xlu0 %v2758_v29, %s2200_s21 }
  0x88   : > { %v2770_v6 = vpop.permute.xlu1 %384 }
  0x89   : > { %4206 = vst [vmem:[#allocation50_spill] sm:$0xff] %v2770_v6  ;;  %v2776_v9 = vpop.permute.xlu0 %380  ;;  %v555_v6 = vrot.slane %v2567_v44, 2  ;;  %v2805_v44 = vsel %vm476_vm1, %v552_v4, %v553_v45 }
  0x8a   : > { %4208 = vst [vmem:[#allocation52_spill] sm:$0xff] %v2776_v9  ;;  %611 = vrot.lane.b32.xlu1 %v2766_v21, %s2200_s21  ;;  %4214 = vst [vmem:[#allocation58_spill] sm:$0xff] %v2805_v44 }
  0x8b   : > { %609 = vrot.lane.b32.xlu0 %v2773_v61, %s2200_s21  ;;  %v2800_v47 = vsel %vm476_vm1, %v553_v45, %v555_v6 }
  0x8c   : > { %v2787_v39 = vpop.permute.xlu1 %386  ;;  %4213 = vst [vmem:[#allocation57_spill] sm:$0xff] %v2800_v47 }
  0x8d   : > { %4210 = vst [vmem:[#allocation54_spill] sm:$0xff] %v2787_v39  ;;  %v2793_v9 = vpop.permute.xlu0 %382 }
  0x8e   : > { %4212 = vst [vmem:[#allocation56_spill] sm:$0xff] %v2793_v9  ;;  %615 = vrot.lane.b32.xlu1 %v2783_v55, %s2200_s21 }
  0x8f   : > { %613 = vrot.lane.b32.xlu0 %v2790_v10, %s2200_s21 }
  0x90   : > { %v2802_v21 = vpop.permute.xlu1 %390 }
  0x91   : > { %v2807_v63 = vpop.permute.xlu0 %388 }
  0x92   : > { %619 = vrot.lane.b32.xlu1 %v2800_v47, %s2200_s21 }
  0x93   : > { %617 = vrot.lane.b32.xlu0 %v2805_v44, %s2200_s21 }
  0x94   : > { %v2813_v52 = vpop.permute.xlu1 %394 }
  0x95   : > { %v2815_v39 = vpop.permute.xlu0 %392 }
  0x96   : > { %657 = vrot.lane.b32.xlu1 %v2257_v1, %s2201_s22 }
  0x97   : > { %655 = vrot.lane.b32.xlu0 %v2254_v0, %s2201_s22 }
  0x98   : > { %v2821_v6 = vpop.permute.xlu1 %398 }
  0x99   : > { %v2823_v45 = vpop.permute.xlu0 %396 }
  0x9a   : > { %661 = vrot.lane.b32.xlu1 %v2277_v11, %s2201_s22 }
  0x9b   : > { %659 = vrot.lane.b32.xlu0 %v2287_v15, %s2201_s22 }
  0x9c   : > { %v2829_v4 = vpop.permute.xlu1 %402 }
  0x9d   : > { %v2831_v47 = vpop.permute.xlu0 %400 }
  0x9e   : > { %665 = vrot.lane.b32.xlu1 %v2301_v22, %s2201_s22 }
  0x9f   : > { %663 = vrot.lane.b32.xlu0 %v2307_v24, %s2201_s22 }
  0xa0   : > { %v2837_v0 = vpop.permute.xlu1 %406 }
  0xa1   : > { %v2839_v1 = vpop.permute.xlu0 %404 }
  0xa2   : > { %669 = vrot.lane.b32.xlu1 %v2322_v30, %s2201_s22 }
  0xa3   : > { %667 = vrot.lane.b32.xlu0 %v2328_v32, %s2201_s22 }
  0xa4   : > { %v2845_v44 = vpop.permute.xlu1 %410 }
  0xa5   : > { %v2847_v55 = vpop.permute.xlu0 %408 }
  0xa6   : > { %673 = vrot.lane.b32.xlu1 %v2344_v38, %s2201_s22 }
  0xa7   : > { %671 = vrot.lane.b32.xlu0 %v2350_v40, %s2201_s22 }
  0xa8   : > { %v2853_v10 = vpop.permute.xlu1 %414 }
  0xa9   : > { %4215 = vst [vmem:[#allocation59_spill] sm:$0xff] %v2853_v10  ;;  %v2855_v9 = vpop.permute.xlu0 %412 }
  0xaa   : > { %4216 = vst [vmem:[#allocation60_spill] sm:$0xff] %v2855_v9  ;;  %677 = vrot.lane.b32.xlu1 %v2366_v46, %s2201_s22 }
  0xab   : > { %675 = vrot.lane.b32.xlu0 %v2372_v48, %s2201_s22 }
  0xac   : > { %v2861_v61 = vpop.permute.xlu1 %418 }
  0xad   : > { %4217 = vst [vmem:[#allocation61_spill] sm:$0xff] %v2861_v61  ;;  %v2863_v57 = vpop.permute.xlu0 %416 }
  0xae   : > { %4218 = vst [vmem:[#allocation62_spill] sm:$0xff] %v2863_v57  ;;  %681 = vrot.lane.b32.xlu1 %v2388_v54, %s2201_s22 }
  0xaf   : > { %679 = vrot.lane.b32.xlu0 %v2394_v56, %s2201_s22 }
  0xb0   : > { %v2869_v36 = vpop.permute.xlu1 %422 }
  0xb1   : > { %v2871_v10 = vpop.permute.xlu0 %420 }
  0xb2   : > { %685 = vrot.lane.b32.xlu1 %v2410_v62, %s2201_s22 }
  0xb3   : > { %683 = vrot.lane.b32.xlu0 %v2416_v3, %s2201_s22 }
  0xb4   : > { %v2877_v9 = vpop.permute.xlu1 %426 }
  0xb5   : > { %v2879_v61 = vpop.permute.xlu0 %424 }
  0xb6   : > { %689 = vrot.lane.b32.xlu1 %v2432_v16, %s2201_s22 }
  0xb7   : > { %687 = vrot.lane.b32.xlu0 %v2438_v19, %s2201_s22 }
  0xb8   : > { %v2885_v57 = vpop.permute.xlu1 %430 }
  0xb9   : > { %v2887_v29 = vpop.permute.xlu0 %428 }
  0xba   : > { %693 = vrot.lane.b32.xlu1 %v2454_v34, %s2201_s22 }
  0xbb   : > { %691 = vrot.lane.b32.xlu0 %v2460_v37, %s2201_s22 }
  0xbc   : > { %v2893_v62 = vpop.permute.xlu1 %434 }
  0xbd   : > { %v2895_v3 = vpop.permute.xlu0 %432 }
  0xbe   : > { %697 = vrot.lane.b32.xlu1 %v2476_v53, %s2201_s22 }
  0xbf   : > { %695 = vrot.lane.b32.xlu0 %v2482_v59, %s2201_s22 }
  0xc0   : > { %v2901_v16 = vpop.permute.xlu1 %438 }
  0xc1   : > { %v2903_v19 = vpop.permute.xlu0 %436 }
  0xc2   : > { %701 = vrot.lane.b32.xlu1 %v2498_v26, %s2201_s22 }
  0xc3   : > { %699 = vrot.lane.b32.xlu0 %v2504_v50, %s2201_s22 }
  0xc4   : > { %v2909_v31 = vpop.permute.xlu1 %442 }
  0xc5   : > { %v2911_v5 = vpop.permute.xlu0 %440 }
  0xc6   : > { %705 = vrot.lane.b32.xlu1 %v2520_v20, %s2201_s22 }
  0xc7   : > { %703 = vrot.lane.b32.xlu0 %v2526_v13, %s2201_s22 }
  0xc8   : > { %v2917_v27 = vpop.permute.xlu1 %559 }
  0xc9   : > { %4219 = vst [vmem:[#allocation63_spill] sm:$0xff] %v2917_v27  ;;  %v2919_v58 = vpop.permute.xlu0 %557  ;;  %v2934_v27 = vld [vmem:[%s2251_s19 + $0x188] sm:$0xff] }
  0xca   : > { %4220 = vst [vmem:[#allocation64_spill] sm:$0xff] %v2919_v58  ;;  %709 = vrot.lane.b32.xlu1 %v2542_v60, %s2201_s22  ;;  %4223 = vst [vmem:[#allocation67_spill] sm:$0xff] %v2934_v27  ;;  %v1261_v58 = vsel %vm1255_vm2, %v2277_v11, %v2802_v21  ;;  %v1263_v21 = vsel %vm1255_vm2, %v2301_v22, %v2813_v52 }
  0xcb   : > { %707 = vrot.lane.b32.xlu0 %v2548_v42, %s2201_s22 }
  0xcc   : > { %v2925_v23 = vpop.permute.xlu1 %563 }
  0xcd   : > { %4221 = vst [vmem:[#allocation65_spill] sm:$0xff] %v2925_v23  ;;  %v2927_v43 = vpop.permute.xlu0 %561  ;;  %v1260_v23 = vsel %vm1255_vm2, %v2287_v15, %v2807_v63  ;;  %v1265_v63 = vsel %vm1255_vm2, %v2322_v30, %v2821_v6  ;;  %v1266_v30 = vsel %vm1255_vm2, %v2350_v40, %v2831_v47  ;;  %v1268_v40 = vsel %vm1255_vm2, %v2372_v48, %v2839_v1 }
  0xce   : > { %4222 = vst [vmem:[#allocation66_spill] sm:$0xff] %v2927_v43  ;;  %713 = vrot.lane.b32.xlu1 %v2564_v49, %s2201_s22  ;;  %v1270_v48 = vsel %vm1255_vm2, %v2394_v56, %v2847_v55  ;;  %v4231_v56 = vld [vmem:[#allocation9_spill] sm:$0xff] }
  0xcf   : > { %711 = vrot.lane.b32.xlu0 %v2570_v8, %s2201_s22 }
  0xd0   : > { %v568_v41 = vpop.permute.xlu1 %567 }
  0xd1   : > { %v2946_v43 = vsel %vm1288_vm3, %v1261_v58, %v568_v41  ;;  %v566_v14 = vpop.permute.xlu0 %565  ;;  %v1262_v41 = vsel %vm1255_vm2, %v2307_v24, %v2815_v39 }
  0xd2   : > { %v2949_v8 = vsel %vm1288_vm3, %v1260_v23, %v566_v14  ;;  %717 = vrot.lane.b32.xlu1 %v2934_v27, %s2201_s22 }
  0xd3   : > { %715 = vrot.lane.b32.xlu0 %v2940_v35, %s2201_s22 }
  0xd4   : > { %v572_v11 = vpop.permute.xlu1 %571 }
  0xd5   : > { %v2962_v58 = vsel %vm1288_vm3, %v1263_v21, %v572_v11  ;;  %v570_v14 = vpop.permute.xlu0 %569  ;;  %v1264_v11 = vsel %vm1255_vm2, %v2328_v32, %v2823_v45 }
  0xd6   : > { %v2965_v23 = vsel %vm1288_vm3, %v1262_v41, %v570_v14  ;;  %759 = vrot.lane.b32.xlu1 %v2294_v17, %s2202_s23  ;;  %v4225_v14 = vld [vmem:[#allocation3_spill] sm:$0xff] }
  0xd7   : > { %757 = vrot.lane.b32.xlu0 %v2280_v12, %s2202_s23  ;;  %v1267_v12 = vsel %vm1255_vm2, %v2344_v38, %v2829_v4  ;;  %v1269_v38 = vsel %vm1255_vm2, %v2366_v46, %v2837_v0  ;;  %v1271_v46 = vsel %vm1255_vm2, %v2388_v54, %v2845_v44  ;;  %v4230_v44 = vld [vmem:[#allocation8_spill] sm:$0xff] }
  0xd8   : > { %v576_v52 = vpop.permute.xlu1 %575 }
  0xd9   : > { %v2978_v39 = vsel %vm1288_vm3, %v1265_v63, %v576_v52  ;;  %v574_v21 = vpop.permute.xlu0 %573 }
  0xda   : > { %v2981_v41 = vsel %vm1288_vm3, %v1264_v11, %v574_v21  ;;  %763 = vrot.lane.b32.xlu1 %v2313_v25, %s2202_s23  ;;  %v4226_v11 = vld [vmem:[#allocation4_spill] sm:$0xff]  ;;  %v4227_v21 = vld [vmem:[#allocation5_spill] sm:$0xff] }
  0xdb   : > { %761 = vrot.lane.b32.xlu0 %v2318_v28, %s2202_s23 }
  0xdc   : > { %v580_v17 = vpop.permute.xlu1 %579 }
  0xdd   : > { %v2994_v32 = vsel %vm1288_vm3, %v1267_v12, %v580_v17  ;;  %v578_v6 = vpop.permute.xlu0 %577 }
  0xde   : > { %v2997_v45 = vsel %vm1288_vm3, %v1266_v30, %v578_v6  ;;  %767 = vrot.lane.b32.xlu1 %v2335_v33, %s2202_s23  ;;  %v4228_v30 = vld [vmem:[#allocation6_spill] sm:$0xff]  ;;  %v4229_v6 = vld [vmem:[#allocation7_spill] sm:$0xff] }
  0xdf   : > { %765 = vrot.lane.b32.xlu0 %v4225_v14, %s2202_s23 }
  0xe0   : > { %v584_v4 = vpop.permute.xlu1 %583 }
  0xe1   : > { %v3010_v47 = vsel %vm1288_vm3, %v1269_v38, %v584_v4  ;;  %v582_v63 = vpop.permute.xlu0 %581 }
  0xe2   : > { %v3013_v52 = vsel %vm1288_vm3, %v1268_v40, %v582_v63  ;;  %771 = vrot.lane.b32.xlu1 %v4226_v11, %s2202_s23  ;;  %v4233_v40 = vld [vmem:[#allocation10_spill] sm:$0xff]  ;;  %v4234_v63 = vld [vmem:[#allocation11_spill] sm:$0xff] }
  0xe3   : > { %769 = vrot.lane.b32.xlu0 %v4227_v21, %s2202_s23 }
  0xe4   : > { %v588_v0 = vpop.permute.xlu1 %587 }
  0xe5   : > { %v3026_v1 = vsel %vm1288_vm3, %v1271_v46, %v588_v0  ;;  %v586_v12 = vpop.permute.xlu0 %585  ;;  %v1277_v46 = vsel %vm1255_vm2, %v2454_v34, %v2869_v36  ;;  %v1279_v36 = vsel %vm1255_vm2, %v2476_v53, %v2877_v9  ;;  %v1281_v9 = vsel %vm1255_vm2, %v2498_v26, %v2885_v57 }
  0xe6   : > { %v3029_v17 = vsel %vm1288_vm3, %v1270_v48, %v586_v12  ;;  %775 = vrot.lane.b32.xlu1 %v4228_v30, %s2202_s23  ;;  %v1276_v48 = vsel %vm1255_vm2, %v2460_v37, %v2871_v10  ;;  %v1278_v10 = vsel %vm1255_vm2, %v2482_v59, %v2879_v61  ;;  %v1280_v61 = vsel %vm1255_vm2, %v2504_v50, %v2887_v29 }
  0xe7   : > { %773 = vrot.lane.b32.xlu0 %v4229_v6, %s2202_s23  ;;  %v1283_v57 = vsel %vm1255_vm2, %v2520_v20, %v2893_v62  ;;  %v1282_v29 = vsel %vm1255_vm2, %v2526_v13, %v2895_v3  ;;  %v1284_v3 = vsel %vm1255_vm2, %v2548_v42, %v2903_v19  ;;  %v4239_v42 = vld [vmem:[#allocation24_spill] sm:$0xff] }
  0xe8   : > { %v3035_v38 = vpop.permute.xlu1 %591 }
  0xe9   : > { %v3037_v54 = vpop.permute.xlu0 %589 }
  0xea   : > { %779 = vrot.lane.b32.xlu1 %v4230_v44, %s2202_s23 }
  0xeb   : > { %777 = vrot.lane.b32.xlu0 %v4231_v56, %s2202_s23 }
  0xec   : > { %v3043_v55 = vpop.permute.xlu1 %595 }
  0xed   : > { %4232 = vst [vmem:[#allocation3_spill] sm:$0xff] %v3043_v55  ;;  %v3045_v4 = vpop.permute.xlu0 %593 }
  0xee   : > { %783 = vrot.lane.b32.xlu1 %v4233_v40, %s2202_s23  ;;  %v4235_v40 = vld [vmem:[#allocation12_spill] sm:$0xff] }
  0xef   : > { %781 = vrot.lane.b32.xlu0 %v4234_v63, %s2202_s23  ;;  %v4236_v63 = vld [vmem:[#allocation13_spill] sm:$0xff] }
  0xf0   : > { %v600_v0 = vpop.permute.xlu1 %599 }
  0xf1   : > { %v3058_v12 = vsel %vm1288_vm3, %v1277_v46, %v600_v0  ;;  %v598_v27 = vpop.permute.xlu0 %597 }
  0xf2   : > { %v3061_v35 = vsel %vm1288_vm3, %v1276_v48, %v598_v27  ;;  %787 = vrot.lane.b32.xlu1 %v4235_v40, %s2202_s23  ;;  %v4237_v48 = vld [vmem:[#allocation14_spill] sm:$0xff]  ;;  %v4238_v40 = vld [vmem:[#allocation15_spill] sm:$0xff] }
  0xf3   : > { %785 = vrot.lane.b32.xlu0 %v4236_v63, %s2202_s23 }
  0xf4   : > { %v604_v55 = vpop.permute.xlu1 %603 }
  0xf5   : > { %v3074_v46 = vsel %vm1288_vm3, %v1279_v36, %v604_v55  ;;  %v602_v27 = vpop.permute.xlu0 %601 }
  0xf6   : > { %v3077_v0 = vsel %vm1288_vm3, %v1278_v10, %v602_v27  ;;  %791 = vrot.lane.b32.xlu1 %v4237_v48, %s2202_s23 }
  0xf7   : > { %789 = vrot.lane.b32.xlu0 %v4238_v40, %s2202_s23 }
  0xf8   : > { %v608_v63 = vpop.permute.xlu1 %607 }
  0xf9   : > { %v3090_v55 = vsel %vm1288_vm3, %v1281_v9, %v608_v63  ;;  %v606_v36 = vpop.permute.xlu0 %605 }
  0xfa   : > { %v3093_v10 = vsel %vm1288_vm3, %v1280_v61, %v606_v36  ;;  %890 = vrot.lane.b32.xlu1 %v2719_v18, %s2203_s24 }
  0xfb   : > { %858 = vrot.lane.b32.xlu0 %v2615_v51, %s2203_s24  ;;  %v1285_v51 = vsel %vm1255_vm2, %v2542_v60, %v2901_v16  ;;  %v1287_v60 = vsel %vm1255_vm2, %v2564_v49, %v2909_v31  ;;  %v1286_v16 = vsel %vm1255_vm2, %v4239_v42, %v2911_v5  ;;  %v1523_v49 = vld [vmem:[%s4047_s1 + $0x20] sm:$0xf]  ;;  %v4241_v31 = vld [vmem:[#allocation17_spill] sm:$0xff] }
  0xfc   : > { %v612_v27 = vpop.permute.xlu1 %611  ;;  %2054 = vmatprep.subr.msk.mxu0 %vm1628_vm4, %v1523_v49  ;;  %2112 = vmatprep.subr.msk.mxu1 %vm1628_vm4, %v1523_v49 }
  0xfd   : > { %v3106_v63 = vsel %vm1288_vm3, %v1283_v57, %v612_v27  ;;  %v610_v9 = vpop.permute.xlu0 %609  ;;  %2055 = vmatpush3.msk.msra.mxu0 %vm1628_vm4, %v1523_v49  ;;  %2117 = vmatpush3.msk.msra.mxu1 %vm1628_vm4, %v1523_v49 }
  0xfe   : > { %v3109_v61 = vsel %vm1288_vm3, %v1282_v29, %v610_v9  ;;  %892 = vrot.lane.b32.xlu1 %v2714_v7, %s2203_s24 }
  0xff   : > { %860 = vrot.lane.b32.xlu0 %v2610_v2, %s2203_s24 }
 0x100   : > { %v616_v62 = vpop.permute.xlu1 %615 }
 0x101   : > { %v3122_v36 = vsel %vm1288_vm3, %v1285_v51, %v616_v62  ;;  %v614_v57 = vpop.permute.xlu0 %613  ;;  %v1521_v51 = vld [vmem:[%s4047_s1 + $0x10] sm:$0xff] }
 0x102   : > { %v3125_v27 = vsel %vm1288_vm3, %v1284_v3, %v614_v57  ;;  %988 = vrot.lane.b32.xlu1 %v2460_v37, %s2204_s25  ;;  %v1519_v57 = vld [vmem:[%s4047_s1] sm:$0xff] }
 0x103   : > { %956 = vrot.lane.b32.xlu0 %v2287_v15, %s2204_s25  ;;  %v4240_v15 = vld [vmem:[#allocation2_spill] sm:$0xff] }
 0x104   : > { %v620_v2 = vpop.permute.xlu1 %619 }
 0x105   : > { %v3138_v19 = vsel %vm1288_vm3, %v1287_v60, %v620_v2  ;;  %v618_v29 = vpop.permute.xlu0 %617 }
 0x106   : > { %v3141_v9 = vsel %vm1288_vm3, %v1286_v16, %v618_v29  ;;  %990 = vrot.lane.b32.xlu1 %v2454_v34, %s2204_s25  ;;  %v1522_v34 = vld [vmem:[%s4047_s1 + $0x18] sm:$0xff]  ;;  %v4242_v16 = vld [vmem:[#allocation30_spill] sm:$0xff]  ;;  %v4243_v29 = vld [vmem:[#allocation16_spill] sm:$0xff] }
 0x107   : > { %958 = vrot.lane.b32.xlu0 %v4240_v15, %s2204_s25  ;;  %2056 = vmatprep.subr.mxu0 %v1522_v34 }
 0x108   : > { %v3150_v37 = vpop.permute.xlu1 %657  ;;  %2113 = vmatprep.subr.mxu1 %v1522_v34  ;;  %2057 = vmatpush3.msra.mxu0 %v1522_v34 }
 0x109   : > { %v3152_v5 = vpop.permute.xlu0 %655  ;;  %2118 = vmatpush3.msra.mxu1 %v1522_v34  ;;  %2058 = vmatprep.subr.mxu0 %v1521_v51  ;;  %v4244_v34 = vld [vmem:[#allocation44_spill] sm:$0xff] }
 0x10a   : > { %1090 = vrot.lane.b32.xlu1 %v4241_v31, %s2205_s30  ;;  %2114 = vmatprep.subr.mxu1 %v1521_v51 }
 0x10b   : > { %1058 = vrot.lane.b32.xlu0 %v2318_v28, %s2205_s30  ;;  %2059 = vmatpush3.msra.mxu0 %v1521_v51  ;;  %v1520_v28 = vld [vmem:[%s4047_s1 + $0x8] sm:$0xff] }
 0x10c   : > { %v3164_v62 = vpop.permute.xlu1 %661  ;;  %2119 = vmatpush3.msra.mxu1 %v1521_v51  ;;  %2060 = vmatprep.subr.mxu0 %v1520_v28 }
 0x10d   : > { %v3166_v3 = vpop.permute.xlu0 %659  ;;  %2115 = vmatprep.subr.mxu1 %v1520_v28  ;;  %2061 = vmatpush3.msra.mxu0 %v1520_v28 }
 0x10e   : > { %1060 = vrot.lane.b32.xlu1 %v2313_v25, %s2205_s30  ;;  %2120 = vmatpush3.msra.mxu1 %v1520_v28 }
 0x10f   : > { %793 = vrot.lane.b32.xlu0 %v4241_v31, %s2202_s23  ;;  %2062 = vmatprep.subr.mxu0 %v1519_v57 }
 0x110   : > { %v666_v60 = vpop.permute.xlu1 %665  ;;  %2116 = vmatprep.subr.mxu1 %v1519_v57  ;;  %2063 = vmatpush3.msra.mxu0 %v1519_v57 }
 0x111   : > { %v3180_v25 = vsel %vm1321_vm5, %v2946_v43, %v666_v60  ;;  %v664_v2 = vpop.permute.xlu0 %663  ;;  %2121 = vmatpush3.msra.mxu1 %v1519_v57 }
 0x112   : > { %v3184_v42 = vsel %vm1321_vm5, %v2949_v8, %v664_v2  ;;  %1159 = vrot.lane.b32.xlu1 %v4242_v16, %s2206_s10  ;;  %v4246_v2 = vld [vmem:[#allocation43_spill] sm:$0xff] }
 0x113   : > { %1092 = vrot.lane.b32.xlu0 %v4243_v29, %s2205_s30 }
 0x114   : > { %v670_v15 = vpop.permute.xlu1 %669 }
 0x115   : > { %v3192_v43 = vsel %vm1321_vm5, %v2962_v58, %v670_v15  ;;  %v668_v49 = vpop.permute.xlu0 %667 }
 0x116   : > { %v3196_v8 = vsel %vm1321_vm5, %v2965_v23, %v668_v49  ;;  %795 = vrot.lane.b32.xlu1 %v4243_v29, %s2202_s23 }
 0x117   : > { %1191 = vrot.lane.b32.xlu0 %v4244_v34, %s2206_s10 }
 0x118   : > { %v674_v31 = vpop.permute.xlu1 %673 }
 0x119   : > { %v3204_v51 = vsel %vm1321_vm5, %v2978_v39, %v674_v31  ;;  %v672_v28 = vpop.permute.xlu0 %671 }
 0x11a   : > { %v3208_v58 = vsel %vm1321_vm5, %v2981_v41, %v672_v28  ;;  %894 = vrot.lane.b32.xlu1 %v4244_v34, %s2203_s24  ;;  %v4247_v41 = vld [vmem:[#allocation29_spill] sm:$0xff]  ;;  %v4252_v28 = vld [vmem:[#allocation19_spill] sm:$0xff] }
 0x11b   : > { %862 = vrot.lane.b32.xlu0 %v4242_v16, %s2203_s24 }
 0x11c   : > { %v678_v23 = vpop.permute.xlu1 %677 }
 0x11d   : > { %v3216_v57 = vsel %vm1321_vm5, %v2994_v32, %v678_v23  ;;  %v676_v60 = vpop.permute.xlu0 %675 }
 0x11e   : > { %4245 = vst [vmem:[#allocation4_spill] sm:$0xff] %v3216_v57  ;;  %v3220_v39 = vsel %vm1321_vm5, %v2997_v45, %v676_v60  ;;  %1193 = vrot.lane.b32.xlu1 %v4246_v2, %s2206_s10 }
 0x11f   : > { %1161 = vrot.lane.b32.xlu0 %v4247_v41, %s2206_s10 }
 0x120   : > { %v682_v29 = vpop.permute.xlu1 %681 }
 0x121   : > { %v3228_v16 = vsel %vm1321_vm5, %v3010_v47, %v682_v29  ;;  %v680_v15 = vpop.permute.xlu0 %679 }
 0x122   : > { %4248 = vst [vmem:[#allocation5_spill] sm:$0xff] %v3228_v16  ;;  %v3232_v32 = vsel %vm1321_vm5, %v3013_v52, %v680_v15  ;;  %896 = vrot.lane.b32.xlu1 %v4246_v2, %s2203_s24  ;;  %v4253_v2 = vld [vmem:[#allocation32_spill] sm:$0xff] }
 0x123   : > { %4249 = vst [vmem:[#allocation6_spill] sm:$0xff] %v3232_v32  ;;  %864 = vrot.lane.b32.xlu0 %v4247_v41, %s2203_s24 }
 0x124   : > { %v686_v45 = vpop.permute.xlu1 %685 }
 0x125   : > { %v3240_v49 = vsel %vm1321_vm5, %v3026_v1, %v686_v45  ;;  %v684_v34 = vpop.permute.xlu0 %683 }
 0x126   : > { %4250 = vst [vmem:[#allocation7_spill] sm:$0xff] %v3240_v49  ;;  %v3244_v47 = vsel %vm1321_vm5, %v3029_v17, %v684_v34  ;;  %992 = vrot.lane.b32.xlu1 %v2482_v59, %s2204_s25  ;;  %v4274_v49 = vld [vmem:[#allocation33_spill] sm:$0xff] }
 0x127   : > { %4251 = vst [vmem:[#allocation8_spill] sm:$0xff] %v3244_v47  ;;  %960 = vrot.lane.b32.xlu0 %v2307_v24, %s2204_s25 }
 0x128   : > { %v3250_v52 = vpop.permute.xlu1 %689 }
 0x129   : > { %v3252_v31 = vpop.permute.xlu0 %687 }
 0x12a   : > { %994 = vrot.lane.b32.xlu1 %v2476_v53, %s2204_s25 }
 0x12b   : > { %962 = vrot.lane.b32.xlu0 %v2301_v22, %s2204_s25 }
 0x12c   : > { %v3258_v1 = vpop.permute.xlu1 %693 }
 0x12d   : > { %v3260_v17 = vpop.permute.xlu0 %691 }
 0x12e   : > { %1094 = vrot.lane.b32.xlu1 %v4252_v28, %s2205_s30 }
 0x12f   : > { %1062 = vrot.lane.b32.xlu0 %v4225_v14, %s2205_s30 }
 0x130   : > { %v698_v24 = vpop.permute.xlu1 %697 }
 0x131   : > { %v3268_v59 = vsel %vm1321_vm5, %v3058_v12, %v698_v24  ;;  %v696_v23 = vpop.permute.xlu0 %695 }
 0x132   : > { %v3272_v53 = vsel %vm1321_vm5, %v3061_v35, %v696_v23  ;;  %1064 = vrot.lane.b32.xlu1 %v2335_v33, %s2205_s30  ;;  %v4254_v35 = vld [vmem:[#allocation18_spill] sm:$0xff]  ;;  %v4261_v23 = vld [vmem:[#allocation31_spill] sm:$0xff] }
 0x133   : > { %797 = vrot.lane.b32.xlu0 %v4252_v28, %s2202_s23 }
 0x134   : > { %v702_v22 = vpop.permute.xlu1 %701 }
 0x135   : > { %v3280_v14 = vsel %vm1321_vm5, %v3074_v46, %v702_v22  ;;  %v700_v60 = vpop.permute.xlu0 %699 }
 0x136   : > { %v3284_v12 = vsel %vm1321_vm5, %v3077_v0, %v700_v60  ;;  %1163 = vrot.lane.b32.xlu1 %v4253_v2, %s2206_s10  ;;  %v4255_v0 = vld [vmem:[#allocation46_spill] sm:$0xff] }
 0x137   : > { %1096 = vrot.lane.b32.xlu0 %v4254_v35, %s2205_s30 }
 0x138   : > { %v706_v33 = vpop.permute.xlu1 %705 }
 0x139   : > { %v3292_v41 = vsel %vm1321_vm5, %v3090_v55, %v706_v33  ;;  %v704_v29 = vpop.permute.xlu0 %703 }
 0x13a   : > { %v3296_v46 = vsel %vm1321_vm5, %v3093_v10, %v704_v29  ;;  %799 = vrot.lane.b32.xlu1 %v4254_v35, %s2202_s23  ;;  %v2156_v29 = vld [vmem:[%s2251_s19 + $0x68] sm:$0xff] }
 0x13b   : > { %1195 = vrot.lane.b32.xlu0 %v4255_v0, %s2206_s10 }
 0x13c   : > { %v710_v15 = vpop.permute.xlu1 %709 }
 0x13d   : > { %v3304_v45 = vsel %vm1321_vm5, %v3106_v63, %v710_v15  ;;  %v708_v34 = vpop.permute.xlu0 %707 }
 0x13e   : > { %4256 = vst [vmem:[#allocation9_spill] sm:$0xff] %v3304_v45  ;;  %v3308_v55 = vsel %vm1321_vm5, %v3109_v61, %v708_v34  ;;  %898 = vrot.lane.b32.xlu1 %v4255_v0, %s2203_s24  ;;  %v4260_v61 = vld [vmem:[#allocation45_spill] sm:$0xff] }
 0x13f   : > { %4257 = vst [vmem:[#allocation14_spill] sm:$0xff] %v3308_v55  ;;  %866 = vrot.lane.b32.xlu0 %v4253_v2, %s2203_s24  ;;  %v4264_v34 = vld [vmem:[#allocation21_spill] sm:$0xff]  ;;  %v4281_v55 = vld [vmem:[#allocation51_spill] sm:$0xff] }
 0x140   : > { %v714_v10 = vpop.permute.xlu1 %713 }
 0x141   : > { %v3316_v28 = vsel %vm1321_vm5, %v3122_v36, %v714_v10  ;;  %v712_v24 = vpop.permute.xlu0 %711 }
 0x142   : > { %4258 = vst [vmem:[#allocation15_spill] sm:$0xff] %v3316_v28  ;;  %v3320_v63 = vsel %vm1321_vm5, %v3125_v27, %v712_v24  ;;  %1197 = vrot.lane.b32.xlu1 %v4260_v61, %s2206_s10 }
 0x143   : > { %4259 = vst [vmem:[#allocation24_spill] sm:$0xff] %v3320_v63  ;;  %1165 = vrot.lane.b32.xlu0 %v4261_v23, %s2206_s10  ;;  %v4276_v63 = vld [vmem:[#allocation52_spill] sm:$0xff] }
 0x144   : > { %v718_v22 = vpop.permute.xlu1 %717 }
 0x145   : > { %v3328_v60 = vsel %vm1321_vm5, %v3138_v19, %v718_v22  ;;  %v716_v2 = vpop.permute.xlu0 %715  ;;  %v2155_v19 = vld [vmem:[%s2251_s19 + $0x60] sm:$0xff] }
 0x146   : > { %4262 = vst [vmem:[#allocation2_spill] sm:$0xff] %v3328_v60  ;;  %v3332_v36 = vsel %vm1321_vm5, %v3141_v9, %v716_v2  ;;  %900 = vrot.lane.b32.xlu1 %v4260_v61, %s2203_s24  ;;  %v4265_v61 = vld [vmem:[#allocation34_spill] sm:$0xff] }
 0x147   : > { %4263 = vst [vmem:[#allocation17_spill] sm:$0xff] %v3332_v36  ;;  %868 = vrot.lane.b32.xlu0 %v4261_v23, %s2203_s24  ;;  %v4266_v23 = vld [vmem:[#allocation20_spill] sm:$0xff] }
 0x148   : > { %v3338_v27 = vpop.permute.xlu1 %759 }
 0x149   : > { %v3340_v35 = vpop.permute.xlu0 %757 }
 0x14a   : > { %996 = vrot.lane.b32.xlu1 %v2504_v50, %s2204_s25 }
 0x14b   : > { %964 = vrot.lane.b32.xlu0 %v2155_v19, %s2204_s25 }
 0x14c   : > { %v3346_v33 = vpop.permute.xlu1 %763 }
 0x14d   : > { %v3348_v9 = vpop.permute.xlu0 %761 }
 0x14e   : > { %998 = vrot.lane.b32.xlu1 %v2498_v26, %s2204_s25 }
 0x14f   : > { %966 = vrot.lane.b32.xlu0 %v2156_v29, %s2204_s25 }
 0x150   : > { %v3354_v0 = vpop.permute.xlu1 %767 }
 0x151   : > { %v3356_v15 = vpop.permute.xlu0 %765 }
 0x152   : > { %1098 = vrot.lane.b32.xlu1 %v4264_v34, %s2205_s30 }
 0x153   : > { %1066 = vrot.lane.b32.xlu0 %v4227_v21, %s2205_s30 }
 0x154   : > { %v3362_v50 = vpop.permute.xlu1 %771 }
 0x155   : > { %v3364_v10 = vpop.permute.xlu0 %769 }
 0x156   : > { %1068 = vrot.lane.b32.xlu1 %v4226_v11, %s2205_s30  ;;  %v4268_v11 = vld [vmem:[#allocation48_spill] sm:$0xff] }
 0x157   : > { %801 = vrot.lane.b32.xlu0 %v4264_v34, %s2202_s23 }
 0x158   : > { %v3370_v26 = vpop.permute.xlu1 %775 }
 0x159   : > { %v3372_v24 = vpop.permute.xlu0 %773 }
 0x15a   : > { %1167 = vrot.lane.b32.xlu1 %v4265_v61, %s2206_s10 }
 0x15b   : > { %1100 = vrot.lane.b32.xlu0 %v4266_v23, %s2205_s30 }
 0x15c   : > { %v3378_v21 = vpop.permute.xlu1 %779 }
 0x15d   : > { %4267 = vst [vmem:[#allocation30_spill] sm:$0xff] %v3378_v21  ;;  %v3380_v22 = vpop.permute.xlu0 %777 }
 0x15e   : > { %803 = vrot.lane.b32.xlu1 %v4266_v23, %s2202_s23  ;;  %v4273_v23 = vld [vmem:[#allocation47_spill] sm:$0xff] }
 0x15f   : > { %1199 = vrot.lane.b32.xlu0 %v4268_v11, %s2206_s10 }
 0x160   : > { %v3386_v2 = vpop.permute.xlu1 %783 }
 0x161   : > { %4269 = vst [vmem:[#allocation16_spill] sm:$0xff] %v3386_v2  ;;  %v3388_v19 = vpop.permute.xlu0 %781  ;;  %v4275_v2 = vld [vmem:[#allocation23_spill] sm:$0xff] }
 0x162   : > { %4270 = vst [vmem:[#allocation44_spill] sm:$0xff] %v3388_v19  ;;  %902 = vrot.lane.b32.xlu1 %v4268_v11, %s2203_s24  ;;  %v4277_v19 = vld [vmem:[#allocation36_spill] sm:$0xff] }
 0x163   : > { %870 = vrot.lane.b32.xlu0 %v4265_v61, %s2203_s24 }
 0x164   : > { %v3394_v29 = vpop.permute.xlu1 %787 }
 0x165   : > { %4271 = vst [vmem:[#allocation43_spill] sm:$0xff] %v3394_v29  ;;  %v3396_v34 = vpop.permute.xlu0 %785  ;;  %v2157_v29 = vld [vmem:[%s2251_s19 + $0x78] sm:$0xff] }
 0x166   : > { %4272 = vst [vmem:[#allocation29_spill] sm:$0xff] %v3396_v34  ;;  %1201 = vrot.lane.b32.xlu1 %v4273_v23, %s2206_s10 }
 0x167   : > { %1169 = vrot.lane.b32.xlu0 %v4274_v49, %s2206_s10 }
 0x168   : > { %v3402_v60 = vpop.permute.xlu1 %791 }
 0x169   : > { %v790_v47 = vpop.permute.xlu0 %789 }
 0x16a   : > { %904 = vrot.lane.b32.xlu1 %v4273_v23, %s2203_s24  ;;  %v2158_v23 = vld [vmem:[%s2251_s19 + $0x80] sm:$0xff] }
 0x16b   : > { %872 = vrot.lane.b32.xlu0 %v4274_v49, %s2203_s24 }
 0x16c   : > { %v891_v61 = vpop.permute.xlu1 %890 }
 0x16d   : > { %v859_v11 = vpop.permute.xlu0 %858 }
 0x16e   : > { %1000 = vrot.lane.b32.xlu1 %v2526_v13, %s2204_s25 }
 0x16f   : > { %968 = vrot.lane.b32.xlu0 %v2157_v29, %s2204_s25 }
 0x170   : > { %v3412_v34 = vpop.permute.xlu1 %892 }
 0x171   : > { %v3414_v36 = vpop.permute.xlu0 %860 }
 0x172   : > { %1002 = vrot.lane.b32.xlu1 %v2520_v20, %s2204_s25 }
 0x173   : > { %970 = vrot.lane.b32.xlu0 %v2158_v23, %s2204_s25  ;;  %v2159_v23 = vld [vmem:[%s2251_s19] sm:$0xff] }
 0x174   : > { %v989_v49 = vpop.permute.xlu1 %988  ;;  %v1256_v32 = vsel %vm1255_vm2, %v2159_v23, %v4276_v63 }
 0x175   : > { %v957_v16 = vpop.permute.xlu0 %956 }
 0x176   : > { %1102 = vrot.lane.b32.xlu1 %v4275_v2, %s2205_s30 }
 0x177   : > { %1070 = vrot.lane.b32.xlu0 %v4229_v6, %s2205_s30  ;;  %v4278_v6 = vld [vmem:[#allocation64_spill] sm:$0xff] }
 0x178   : > { %v991_v13 = vpop.permute.xlu1 %990  ;;  %v1289_v57 = vsel %vm1288_vm3, %v1256_v32, %v4278_v6  ;;  %v3449_v32 = vld [vmem:[%s2251_s19 + $0xc0] sm:$0xff]  ;;  %v4280_v6 = vld [vmem:[#allocation60_spill] sm:$0xff] }
 0x179   : > { %v3424_v29 = vpop.permute.xlu0 %958 }
 0x17a   : > { %1072 = vrot.lane.b32.xlu1 %v4228_v30, %s2205_s30  ;;  %v4279_v30 = vld [vmem:[#allocation22_spill] sm:$0xff] }
 0x17b   : > { %805 = vrot.lane.b32.xlu0 %v4275_v2, %s2202_s23  ;;  %v1322_v2 = vsel %vm1321_vm5, %v1289_v57, %v3152_v5  ;;  %v1272_v5 = vsel %vm1255_vm2, %v3449_v32, %v4280_v6 }
 0x17c   : > { %v1091_v20 = vpop.permute.xlu1 %1090  ;;  %v1355_v45 = vsel %vm1354_vm6, %v1322_v2, %v3340_v35 }
 0x17d   : > { %v1059_v28 = vpop.permute.xlu0 %1058  ;;  %v1388_v23 = vsel %vm1387_vm7, %v1355_v45, %v859_v11  ;;  %v1305_v45 = vsel %vm1288_vm3, %v1272_v5, %v3037_v54 }
 0x17e   : > { %1171 = vrot.lane.b32.xlu1 %v4277_v19, %s2206_s10  ;;  %v1421_v57 = vsel %vm1420_vm8, %v1388_v23, %v957_v16 }
 0x17f   : > { %1104 = vrot.lane.b32.xlu0 %v4279_v30, %s2205_s30  ;;  %v1454_v35 = vsel %vm1453_vm9, %v1421_v57, %v1059_v28  ;;  %v3475_v57 = vld [vmem:[%s2251_s19 + $0xc8] sm:$0xff] }
 0x180   : > { %v1061_v21 = vpop.permute.xlu1 %1060 }
 0x181   : > { %v3443_v63 = vpop.permute.xlu0 %793 }
 0x182   : > { %807 = vrot.lane.b32.xlu1 %v4279_v30, %s2202_s23  ;;  %v1338_v30 = vsel %vm1321_vm5, %v1305_v45, %v3252_v31  ;;  %v4283_v45 = vld [vmem:[#allocation49_spill] sm:$0xff] }
 0x183   : > { %1203 = vrot.lane.b32.xlu0 %v4281_v55, %s2206_s10  ;;  %v1371_v16 = vsel %vm1354_vm6, %v1338_v30, %v790_v47  ;;  %v4282_v47 = vld [vmem:[#allocation59_spill] sm:$0xff] }
 0x184   : > { %v1160_v11 = vpop.permute.xlu1 %1159  ;;  %v1404_v23 = vsel %vm1387_vm7, %v1371_v16, %v891_v61  ;;  %v4286_v30 = vld [vmem:[#allocation63_spill] sm:$0xff] }
 0x185   : > { %v1093_v2 = vpop.permute.xlu0 %1092  ;;  %v1487_v6 = vsel %vm1486_vm10, %v1454_v35, %v1160_v11  ;;  %v1437_v54 = vsel %vm1420_vm8, %v1404_v23, %v989_v49  ;;  %v2162_v35 = vld [vmem:[%s2251_s19 + $0x8] sm:$0xff] }
 0x186   : > { %906 = vrot.lane.b32.xlu1 %v4281_v55, %s2203_s24  ;;  %2064 = vmatprep.mubr.msk.f32.mxu0 %vm1531_vm11, %v1487_v6  ;;  %v1470_v31 = vsel %vm1453_vm9, %v1437_v54, %v1091_v20  ;;  %v1273_v55 = vsel %vm1255_vm2, %v3475_v57, %v4282_v47  ;;  %v4285_v20 = vld [vmem:[#allocation35_spill] sm:$0xff] }
 0x187   : > { %874 = vrot.lane.b32.xlu0 %v4277_v19, %s2203_s24  ;;  %v4284_v19 = vld [vmem:[#allocation56_spill] sm:$0xff]  ;;  %v1306_v11 = vsel %vm1288_vm3, %v1273_v55, %v3035_v38 }
 0x188   : > { %v3471_v28 = vpop.permute.xlu1 %795  ;;  %v1257_v49 = vsel %vm1255_vm2, %v2162_v35, %v4284_v19  ;;  %v1339_v16 = vsel %vm1321_vm5, %v1306_v11, %v3250_v52  ;;  %v2163_v35 = vld [vmem:[%s2251_s19 + $0x150] sm:$0xff]  ;;  %v2166_v19 = vld [vmem:[%s2251_s19 + $0x98] sm:$0xff] }
 0x189   : > { %v1192_v5 = vpop.permute.xlu0 %1191  ;;  %v1290_v6 = vsel %vm1288_vm3, %v1257_v49, %v4286_v30  ;;  %v1372_v38 = vsel %vm1354_vm6, %v1339_v16, %v3402_v60 }
 0x18a   : > { %1205 = vrot.lane.b32.xlu1 %v4283_v45, %s2206_s10  ;;  %v1503_v61 = vsel %vm1486_vm10, %v1470_v31, %v1192_v5  ;;  %v1323_v54 = vsel %vm1321_vm5, %v1290_v6, %v3150_v37  ;;  %v1405_v47 = vsel %vm1387_vm7, %v1372_v38, %v3412_v34  ;;  %v2167_v38 = vld [vmem:[%s2251_s19 + $0x18] sm:$0xff] }
 0x18b   : > { %1173 = vrot.lane.b32.xlu0 %v4285_v20, %s2206_s10  ;;  %2088 = vmatprep.mubr.msk.f32.mxu1 %vm1531_vm11, %v1503_v61  ;;  %v1356_v5 = vsel %vm1354_vm6, %v1323_v54, %v3338_v27  ;;  %v1438_v37 = vsel %vm1420_vm8, %v1405_v47, %v991_v13  ;;  %v2164_v13 = vld [vmem:[%s2251_s19 + $0x90] sm:$0xff] }
 0x18c   : > { %v3495_v23 = vpop.permute.xlu1 %894  ;;  %v1389_v52 = vsel %vm1387_vm7, %v1356_v5, %v3414_v36  ;;  %v1471_v27 = vsel %vm1453_vm9, %v1438_v37, %v1093_v2  ;;  %v4288_v5 = vld [vmem:[#allocation50_spill] sm:$0xff] }
 0x18d   : > { %v863_v31 = vpop.permute.xlu0 %862  ;;  %v1422_v60 = vsel %vm1420_vm8, %v1389_v52, %v3424_v29  ;;  %v1258_v47 = vsel %vm1255_vm2, %v2167_v38, %v4288_v5  ;;  %v4289_v52 = vld [vmem:[#allocation38_spill] sm:$0xff] }
 0x18e   : > { %908 = vrot.lane.b32.xlu1 %v4283_v45, %s2203_s24  ;;  %v1455_v34 = vsel %vm1453_vm9, %v1422_v60, %v1061_v21  ;;  %v2165_v21 = vld [vmem:[%s2251_s19 + $0x158] sm:$0xff]  ;;  %v4290_v37 = vld [vmem:[#allocation66_spill] sm:$0xff] }
 0x18f   : > { %876 = vrot.lane.b32.xlu0 %v4285_v20, %s2203_s24  ;;  %v4287_v20 = vld [vmem:[#allocation26_spill] sm:$0xff]  ;;  %v4291_v60 = vld [vmem:[#allocation25_spill] sm:$0xff] }
 0x190   : > { %v1194_v55 = vpop.permute.xlu1 %1193 }
 0x191   : > { %v1504_v45 = vsel %vm1486_vm10, %v1471_v27, %v1194_v55  ;;  %v1162_v61 = vpop.permute.xlu0 %1161 }
 0x192   : > { %v1488_v36 = vsel %vm1486_vm10, %v1455_v34, %v1162_v61  ;;  %1004 = vrot.lane.b32.xlu1 %v2163_v35, %s2204_s25  ;;  %2089 = vmatmul.mubr.msk.f32.vlgmr.msra.gmra.mxu1 %vm1531_vm11, %v1504_v45  ;;  %v3559_v61 = vld [vmem:[%s2251_s19 + $0xd8] sm:$0xff] }
 0x193   : > { %972 = vrot.lane.b32.xlu0 %v2164_v13, %s2204_s25  ;;  %2065 = vmatmul.mubr.msk.f32.vlgmr.msra.gmra.mxu0 %vm1531_vm11, %v1488_v36  ;;  %v4292_v36 = vld [vmem:[#allocation62_spill] sm:$0xff] }
 0x194   : > { %v3524_v29 = vpop.permute.xlu1 %896  ;;  %v1274_v35 = vsel %vm1255_vm2, %v3559_v61, %v4292_v36  ;;  %v4299_v36 = vld [vmem:[#allocation65_spill] sm:$0xff] }
 0x195   : > { %v3526_v2 = vpop.permute.xlu0 %864 }
 0x196   : > { %1006 = vrot.lane.b32.xlu1 %v2165_v21, %s2204_s25 }
 0x197   : > { %974 = vrot.lane.b32.xlu0 %v2166_v19, %s2204_s25 }
 0x198   : > { %v993_v49 = vpop.permute.xlu1 %992 }
 0x199   : > { %v961_v11 = vpop.permute.xlu0 %960 }
 0x19a   : > { %1106 = vrot.lane.b32.xlu1 %v4287_v20, %s2205_s30 }
 0x19b   : > { %1074 = vrot.lane.b32.xlu0 %v4231_v56, %s2205_s30  ;;  %v1291_v56 = vsel %vm1288_vm3, %v1258_v47, %v4290_v37  ;;  %v3587_v37 = vld [vmem:[%s2251_s19 + $0xe0] sm:$0xff] }
 0x19c   : > { %v995_v30 = vpop.permute.xlu1 %994 }
 0x19d   : > { %v963_v6 = vpop.permute.xlu0 %962 }
 0x19e   : > { %1076 = vrot.lane.b32.xlu1 %v4230_v44, %s2205_s30  ;;  %v1324_v44 = vsel %vm1321_vm5, %v1291_v56, %v3166_v3  ;;  %v4293_v3 = vld [vmem:[#allocation55_spill] sm:$0xff] }
 0x19f   : > { %809 = vrot.lane.b32.xlu0 %v4287_v20, %s2202_s23  ;;  %v1357_v55 = vsel %vm1354_vm6, %v1324_v44, %v3348_v9  ;;  %v1307_v9 = vsel %vm1288_vm3, %v1274_v35, %v3045_v4  ;;  %v2170_v44 = vld [vmem:[%s2251_s19 + $0x20] sm:$0xff] }
 0x1a0   : > { %v1095_v16 = vpop.permute.xlu1 %1094  ;;  %v1390_v45 = vsel %vm1387_vm7, %v1357_v55, %v863_v31  ;;  %v1340_v19 = vsel %vm1321_vm5, %v1307_v9, %v3260_v17  ;;  %v4297_v55 = vld [vmem:[#allocation3_spill] sm:$0xff] }
 0x1a1   : > { %v1063_v54 = vpop.permute.xlu0 %1062  ;;  %v1423_v13 = vsel %vm1420_vm8, %v1390_v45, %v961_v11  ;;  %v1373_v11 = vsel %vm1354_vm6, %v1340_v19, %v3443_v63  ;;  %v4294_v63 = vld [vmem:[#allocation61_spill] sm:$0xff] }
 0x1a2   : > { %1175 = vrot.lane.b32.xlu1 %v4289_v52, %s2206_s10  ;;  %v1456_v31 = vsel %vm1453_vm9, %v1423_v13, %v1063_v54  ;;  %v1406_v4 = vsel %vm1387_vm7, %v1373_v11, %v3495_v23  ;;  %v1275_v56 = vsel %vm1255_vm2, %v3587_v37, %v4294_v63  ;;  %v4295_v23 = vld [vmem:[#allocation53_spill] sm:$0xff] }
 0x1a3   : > { %1108 = vrot.lane.b32.xlu0 %v4291_v60, %s2205_s30  ;;  %v1439_v17 = vsel %vm1420_vm8, %v1406_v4, %v993_v49  ;;  %v1308_v45 = vsel %vm1288_vm3, %v1275_v56, %v4297_v55 }
 0x1a4   : > { %v1065_v27 = vpop.permute.xlu1 %1064  ;;  %v1472_v5 = vsel %vm1453_vm9, %v1439_v17, %v1095_v16  ;;  %v4298_v16 = vld [vmem:[#allocation37_spill] sm:$0xff]  ;;  %v1341_v13 = vsel %vm1321_vm5, %v1308_v45, %v3258_v1 }
 0x1a5   : > { %v3553_v34 = vpop.permute.xlu0 %797 }
 0x1a6   : > { %811 = vrot.lane.b32.xlu1 %v4291_v60, %s2202_s23 }
 0x1a7   : > { %1207 = vrot.lane.b32.xlu0 %v4293_v3, %s2206_s10 }
 0x1a8   : > { %v1164_v21 = vpop.permute.xlu1 %1163 }
 0x1a9   : > { %v1489_v20 = vsel %vm1486_vm10, %v1456_v31, %v1164_v21  ;;  %v1097_v38 = vpop.permute.xlu0 %1096  ;;  %v1374_v31 = vsel %vm1354_vm6, %v1341_v13, %v3471_v28  ;;  %v1359_v13 = vsel %vm1354_vm6, %v3184_v42, %v3356_v15  ;;  %v1375_v42 = vsel %vm1354_vm6, %v3272_v53, %v3553_v34  ;;  %v4306_v53 = vld [vmem:[#allocation57_spill] sm:$0xff]  ;;  %v4307_v34 = vld [vmem:[#allocation39_spill] sm:$0xff] }
 0x1aa   : > { %910 = vrot.lane.b32.xlu1 %v4293_v3, %s2203_s24  ;;  %2067 = vmatprep.mubr.msk.f32.mxu0 %vm1531_vm11, %v1489_v20  ;;  %v1407_v20 = vsel %vm1387_vm7, %v1374_v31, %v3524_v29 }
 0x1ab   : > { %878 = vrot.lane.b32.xlu0 %v4289_v52, %s2203_s24  ;;  %v4296_v52 = vld [vmem:[#allocation54_spill] sm:$0xff] }
 0x1ac   : > { %v3583_v54 = vpop.permute.xlu1 %799  ;;  %v1259_v49 = vsel %vm1255_vm2, %v2170_v44, %v4296_v52 }
 0x1ad   : > { %v1196_v47 = vpop.permute.xlu0 %1195  ;;  %v1292_v35 = vsel %vm1288_vm3, %v1259_v49, %v4299_v36  ;;  %v4302_v49 = vld [vmem:[#allocation10_spill] sm:$0xff]  ;;  %v4304_v36 = vld [vmem:[#allocation27_spill] sm:$0xff] }
 0x1ae   : > { %v1505_v60 = vsel %vm1486_vm10, %v1472_v5, %v1196_v47  ;;  %1209 = vrot.lane.b32.xlu1 %v4295_v23, %s2206_s10  ;;  %v1325_v9 = vsel %vm1321_vm5, %v1292_v35, %v3164_v62  ;;  %v1440_v62 = vsel %vm1420_vm8, %v1407_v20, %v995_v30  ;;  %v2172_v30 = vld [vmem:[%s2251_s19 + $0xa8] sm:$0xff]  ;;  %v2173_v47 = vld [vmem:[%s2251_s19 + $0x170] sm:$0xff]  ;;  %v4305_v20 = vld [vmem:[#allocation58_spill] sm:$0xff] }
 0x1af   : > { %1177 = vrot.lane.b32.xlu0 %v4298_v16, %s2206_s10  ;;  %2091 = vmatprep.mubr.msk.f32.mxu1 %vm1531_vm11, %v1505_v60  ;;  %v1358_v19 = vsel %vm1354_vm6, %v1325_v9, %v3346_v33  ;;  %v1473_v33 = vsel %vm1453_vm9, %v1440_v62, %v1097_v38  ;;  %v4300_v60 = vld [vmem:[#allocation28_spill] sm:$0xff] }
 0x1b0   : > { %v899_v3 = vpop.permute.xlu1 %898  ;;  %v1391_v1 = vsel %vm1387_vm7, %v1358_v19, %v3526_v2  ;;  %v2171_v2 = vld [vmem:[%s2251_s19 + $0x168] sm:$0xff] }
 0x1b1   : > { %v867_v21 = vpop.permute.xlu0 %866  ;;  %v1424_v28 = vsel %vm1420_vm8, %v1391_v1, %v963_v6  ;;  %v1408_v15 = vsel %vm1387_vm7, %v1375_v42, %v899_v3  ;;  %v4312_v42 = vld [vmem:[#allocation42_spill] sm:$0xff] }
 0x1b2   : > { %912 = vrot.lane.b32.xlu1 %v4295_v23, %s2203_s24  ;;  %v1457_v29 = vsel %vm1453_vm9, %v1424_v28, %v1065_v27  ;;  %v2174_v27 = vld [vmem:[%s2251_s19 + $0xb0] sm:$0xff]  ;;  %v4301_v23 = vld [vmem:[#allocation11_spill] sm:$0xff]  ;;  %v1392_v31 = vsel %vm1387_vm7, %v1359_v13, %v867_v21  ;;  %v4310_v13 = vld [vmem:[#allocation13_spill] sm:$0xff] }
 0x1b3   : > { %880 = vrot.lane.b32.xlu0 %v4298_v16, %s2203_s24  ;;  %v4303_v16 = vld [vmem:[#allocation40_spill] sm:$0xff] }
 0x1b4   : > { %v1198_v11 = vpop.permute.xlu1 %1197 }
 0x1b5   : > { %v1506_v4 = vsel %vm1486_vm10, %v1473_v33, %v1198_v11  ;;  %v1166_v17 = vpop.permute.xlu0 %1165 }
 0x1b6   : > { %v1490_v5 = vsel %vm1486_vm10, %v1457_v29, %v1166_v17  ;;  %1008 = vrot.lane.b32.xlu1 %v2171_v2, %s2204_s25  ;;  %2092 = vmatmul.mubr.msk.f32.gmra.mxu1 %vm1531_vm11, %v1506_v4 }
 0x1b7   : > { %976 = vrot.lane.b32.xlu0 %v2172_v30, %s2204_s25  ;;  %2068 = vmatmul.mubr.msk.f32.gmra.mxu0 %vm1531_vm11, %v1490_v5  ;;  %v1376_v5 = vsel %vm1354_vm6, %v3268_v59, %v3583_v54  ;;  %v1360_v30 = vsel %vm1354_vm6, %v3180_v25, %v3354_v0 }
 0x1b8   : > { %v901_v6 = vpop.permute.xlu1 %900 }
 0x1b9   : > { %v869_v38 = vpop.permute.xlu0 %868 }
 0x1ba   : > { %1010 = vrot.lane.b32.xlu1 %v2173_v47, %s2204_s25  ;;  %v1409_v47 = vsel %vm1387_vm7, %v1376_v5, %v901_v6 }
 0x1bb   : > { %978 = vrot.lane.b32.xlu0 %v2174_v27, %s2204_s25  ;;  %v1393_v27 = vsel %vm1387_vm7, %v1360_v30, %v869_v38  ;;  %v4308_v38 = vld [vmem:[#allocation68_spill] sm:$0xff] }
 0x1bc   : > { %v997_v63 = vpop.permute.xlu1 %996 }
 0x1bd   : > { %v965_v56 = vpop.permute.xlu0 %964  ;;  %v1441_v21 = vsel %vm1420_vm8, %v1408_v15, %v997_v63 }
 0x1be   : > { %1110 = vrot.lane.b32.xlu1 %v4300_v60, %s2205_s30  ;;  %v1425_v19 = vsel %vm1420_vm8, %v1392_v31, %v965_v56 }
 0x1bf   : > { %1078 = vrot.lane.b32.xlu0 %v4301_v23, %s2205_s30  ;;  %v4309_v23 = vld [vmem:[#allocation67_spill] sm:$0xff] }
 0x1c0   : > { %v999_v44 = vpop.permute.xlu1 %998 }
 0x1c1   : > { %v967_v52 = vpop.permute.xlu0 %966  ;;  %v1442_v63 = vsel %vm1420_vm8, %v1409_v47, %v999_v44  ;;  %v753_v44 = vrot.slane %v4309_v23, 1 }
 0x1c2   : > { %1080 = vrot.lane.b32.xlu1 %v4302_v49, %s2205_s30  ;;  %v1426_v56 = vsel %vm1420_vm8, %v1393_v27, %v967_v52  ;;  %v752_v52 = vrot.slane %v4308_v38, 1 }
 0x1c3   : > { %813 = vrot.lane.b32.xlu0 %v4300_v60, %s2202_s23 }
 0x1c4   : > { %v1099_v55 = vpop.permute.xlu1 %1098 }
 0x1c5   : > { %v1067_v45 = vpop.permute.xlu0 %1066  ;;  %v1474_v29 = vsel %vm1453_vm9, %v1441_v21, %v1099_v55 }
 0x1c6   : > { %1179 = vrot.lane.b32.xlu1 %v4303_v16, %s2206_s10  ;;  %v1458_v1 = vsel %vm1453_vm9, %v1425_v19, %v1067_v45  ;;  %v754_v45 = vsel %vm299_vm0, %v752_v52, %v753_v44 }
 0x1c7   : > { %1112 = vrot.lane.b32.xlu0 %v4304_v36, %s2205_s30 }
 0x1c8   : > { %v1069_v35 = vpop.permute.xlu1 %1068 }
 0x1c9   : > { %v3652_v9 = vpop.permute.xlu0 %801  ;;  %v1459_v60 = vsel %vm1453_vm9, %v1426_v56, %v1069_v35  ;;  %v247_v35 = vld [vmem:[%s2251_s19 + $0x190] sm:$0x3] }
 0x1ca   : > { %815 = vrot.lane.b32.xlu1 %v4304_v36, %s2202_s23  ;;  %v755_v31 = vrot.slane %v247_v35, 1 }
 0x1cb   : > { %1211 = vrot.lane.b32.xlu0 %v4305_v20, %s2206_s10 }
 0x1cc   : > { %v1168_v62 = vpop.permute.xlu1 %1167 }
 0x1cd   : > { %v1491_v28 = vsel %vm1486_vm10, %v1458_v1, %v1168_v62  ;;  %v1101_v33 = vpop.permute.xlu0 %1100  ;;  %v853_v1 = vrot.slane %v4308_v38, 2 }
 0x1ce   : > { %914 = vrot.lane.b32.xlu1 %v4305_v20, %s2203_s24  ;;  %2070 = vmatprep.mubr.msk.f32.mxu0 %vm1531_vm11, %v1491_v28  ;;  %v1475_v59 = vsel %vm1453_vm9, %v1442_v63, %v1101_v33  ;;  %v4311_v20 = vld [vmem:[#allocation12_spill] sm:$0xff]  ;;  %v756_v28 = vsel %vm299_vm0, %v753_v44, %v755_v31  ;;  %v248_v44 = vld [vmem:[%s2251_s19 + $0x198] sm:$0xff] }
 0x1cf   : > { %882 = vrot.lane.b32.xlu0 %v4303_v16, %s2203_s24 }
 0x1d0   : > { %v3672_v11 = vpop.permute.xlu1 %803 }
 0x1d1   : > { %v1200_v4 = vpop.permute.xlu0 %1199 }
 0x1d2   : > { %v1507_v17 = vsel %vm1486_vm10, %v1474_v29, %v1200_v4  ;;  %1213 = vrot.lane.b32.xlu1 %v4306_v53, %s2206_s10  ;;  %v1361_v29 = vsel %vm1354_vm6, %v3196_v8, %v3364_v10  ;;  %v1377_v8 = vsel %vm1354_vm6, %v3284_v12, %v3652_v9  ;;  %v4313_v9 = vld [vmem:[#allocation41_spill] sm:$0xff] }
 0x1d3   : > { %1181 = vrot.lane.b32.xlu0 %v4307_v34, %s2206_s10  ;;  %2094 = vmatprep.mubr.msk.f32.mxu1 %vm1531_vm11, %v1507_v17 }
 0x1d4   : > { %v903_v3 = vpop.permute.xlu1 %902 }
 0x1d5   : > { %v871_v2 = vpop.permute.xlu0 %870  ;;  %v1410_v10 = vsel %vm1387_vm7, %v1377_v8, %v903_v3 }
 0x1d6   : > { %916 = vrot.lane.b32.xlu1 %v4306_v53, %s2203_s24  ;;  %v1394_v17 = vsel %vm1387_vm7, %v1361_v29, %v871_v2 }
 0x1d7   : > { %884 = vrot.lane.b32.xlu0 %v4307_v34, %s2203_s24  ;;  %v856_v34 = vrot.slane %v247_v35, 2 }
 0x1d8   : > { %v1202_v54 = vpop.permute.xlu1 %1201 }
 0x1d9   : > { %v1508_v25 = vsel %vm1486_vm10, %v1475_v59, %v1202_v54  ;;  %v1170_v0 = vpop.permute.xlu0 %1169 }
 0x1da   : > { %v1492_v6 = vsel %vm1486_vm10, %v1459_v60, %v1170_v0  ;;  %1012 = vrot.lane.b32.xlu1 %v4308_v38, %s2204_s25  ;;  %2095 = vmatmul.mubr.msk.f32.gmra.mxu1 %vm1531_vm11, %v1508_v25  ;;  %v1378_v60 = vsel %vm1354_vm6, %v3280_v14, %v3672_v11  ;;  %v1362_v0 = vsel %vm1354_vm6, %v3192_v43, %v3362_v50 }
 0x1db   : > { %980 = vrot.lane.b32.xlu0 %v3449_v32, %s2204_s25  ;;  %2071 = vmatmul.mubr.msk.f32.gmra.mxu0 %vm1531_vm11, %v1492_v6 }
 0x1dc   : > { %v905_v49 = vpop.permute.xlu1 %904 }
 0x1dd   : > { %v873_v55 = vpop.permute.xlu0 %872  ;;  %v1411_v6 = vsel %vm1387_vm7, %v1378_v60, %v905_v49 }
 0x1de   : > { %1014 = vrot.lane.b32.xlu1 %v4309_v23, %s2204_s25  ;;  %v1395_v38 = vsel %vm1387_vm7, %v1362_v0, %v873_v55 }
 0x1df   : > { %982 = vrot.lane.b32.xlu0 %v3475_v57, %s2204_s25  ;;  %v854_v57 = vrot.slane %v4309_v23, 2 }
 0x1e0   : > { %v1001_v16 = vpop.permute.xlu1 %1000 }
 0x1e1   : > { %v969_v36 = vpop.permute.xlu0 %968  ;;  %v855_v21 = vsel %vm476_vm1, %v853_v1, %v854_v57  ;;  %v857_v2 = vsel %vm476_vm1, %v854_v57, %v856_v34  ;;  %v1443_v63 = vsel %vm1420_vm8, %v1410_v10, %v1001_v16  ;;  %v1053_v16 = vrot.slane %v248_v44, 1 }
 0x1e2   : > { %1114 = vrot.lane.b32.xlu1 %v754_v45, %s2205_s30  ;;  %v1427_v53 = vsel %vm1420_vm8, %v1394_v17, %v969_v36  ;;  %v1154_v1 = vrot.slane %v248_v44, 2  ;;  %v1363_v17 = vsel %vm1354_vm6, %v3208_v58, %v3372_v24 }
 0x1e3   : > { %1082 = vrot.lane.b32.xlu0 %v4310_v13, %s2205_s30  ;;  %v250_v13 = vld [vmem:[%s2251_s19 + $0x1a8] sm:$0x3] }
 0x1e4   : > { %v1003_v32 = vpop.permute.xlu1 %1002 }
 0x1e5   : > { %v971_v19 = vpop.permute.xlu0 %970  ;;  %v1444_v23 = vsel %vm1420_vm8, %v1411_v6, %v1003_v32 }
 0x1e6   : > { %1084 = vrot.lane.b32.xlu1 %v4311_v20, %s2205_s30  ;;  %v1428_v14 = vsel %vm1420_vm8, %v1395_v38, %v971_v19  ;;  %v1056_v19 = vrot.slane %v250_v13, 1 }
 0x1e7   : > { %817 = vrot.lane.b32.xlu0 %v754_v45, %s2202_s23  ;;  %v249_v45 = vld [vmem:[%s2251_s19 + $0x1a0] sm:$0xff] }
 0x1e8   : > { %v1103_v62 = vpop.permute.xlu1 %1102  ;;  %v1054_v36 = vrot.slane %v249_v45, 1 }
 0x1e9   : > { %v1071_v33 = vpop.permute.xlu0 %1070  ;;  %v1476_v59 = vsel %vm1453_vm9, %v1443_v63, %v1103_v62 }
 0x1ea   : > { %1183 = vrot.lane.b32.xlu1 %v4312_v42, %s2206_s10  ;;  %v1460_v5 = vsel %vm1453_vm9, %v1427_v53, %v1071_v33  ;;  %v1055_v31 = vsel %vm299_vm0, %v1053_v16, %v1054_v36  ;;  %v1057_v62 = vsel %vm299_vm0, %v1054_v36, %v1056_v19 }
 0x1eb   : > { %1116 = vrot.lane.b32.xlu0 %v756_v28, %s2205_s30 }
 0x1ec   : > { %v1073_v15 = vpop.permute.xlu1 %1072 }
 0x1ed   : > { %v3729_v4 = vpop.permute.xlu0 %805  ;;  %v1461_v43 = vsel %vm1453_vm9, %v1428_v14, %v1073_v15 }
 0x1ee   : > { %819 = vrot.lane.b32.xlu1 %v756_v28, %s2202_s23  ;;  %v1379_v58 = vsel %vm1354_vm6, %v3296_v46, %v3729_v4 }
 0x1ef   : > { %1215 = vrot.lane.b32.xlu0 %v855_v21, %s2206_s10 }
 0x1f0   : > { %v1172_v30 = vpop.permute.xlu1 %1171 }
 0x1f1   : > { %v1493_v47 = vsel %vm1486_vm10, %v1460_v5, %v1172_v30  ;;  %v1105_v27 = vpop.permute.xlu0 %1104 }
 0x1f2   : > { %918 = vrot.lane.b32.xlu1 %v855_v21, %s2203_s24  ;;  %2073 = vmatprep.mubr.msk.f32.mxu0 %vm1531_vm11, %v1493_v47  ;;  %v1477_v11 = vsel %vm1453_vm9, %v1444_v23, %v1105_v27 }
 0x1f3   : > { %886 = vrot.lane.b32.xlu0 %v4312_v42, %s2203_s24  ;;  %v1157_v42 = vrot.slane %v250_v13, 2 }
 0x1f4   : > { %v3747_v56 = vpop.permute.xlu1 %807 }
 0x1f5   : > { %v1204_v54 = vpop.permute.xlu0 %1203  ;;  %v1380_v46 = vsel %vm1354_vm6, %v3292_v41, %v3747_v56 }
 0x1f6   : > { %v1509_v12 = vsel %vm1486_vm10, %v1476_v59, %v1204_v54  ;;  %1217 = vrot.lane.b32.xlu1 %v857_v2, %s2206_s10  ;;  %v1364_v59 = vsel %vm1354_vm6, %v3204_v51, %v3370_v26 }
 0x1f7   : > { %1185 = vrot.lane.b32.xlu0 %v4313_v9, %s2206_s10  ;;  %2097 = vmatprep.mubr.msk.f32.mxu1 %vm1531_vm11, %v1509_v12 }
 0x1f8   : > { %v3755_v3 = vpop.permute.xlu1 %906 }
 0x1f9   : > { %v875_v25 = vpop.permute.xlu0 %874  ;;  %v1412_v24 = vsel %vm1387_vm7, %v1379_v58, %v3755_v3 }
 0x1fa   : > { %920 = vrot.lane.b32.xlu1 %v857_v2, %s2203_s24 }
 0x1fb   : > { %888 = vrot.lane.b32.xlu0 %v4313_v9, %s2203_s24 }
 0x1fc   : > { %v1206_v52 = vpop.permute.xlu1 %1205 }
 0x1fd   : > { %v1510_v50 = vsel %vm1486_vm10, %v1477_v11, %v1206_v52  ;;  %v1174_v49 = vpop.permute.xlu0 %1173 }
 0x1fe   : > { %v1494_v55 = vsel %vm1486_vm10, %v1461_v43, %v1174_v49  ;;  %1016 = vrot.lane.b32.xlu1 %v248_v44, %s2204_s25  ;;  %2098 = vmatmul.mubr.msk.f32.gmra.mxu1 %vm1531_vm11, %v1510_v50  ;;  %v1365_v43 = vsel %vm1354_vm6, %v3220_v39, %v3380_v22 }
 0x1ff   : > { %984 = vrot.lane.b32.xlu0 %v3559_v61, %s2204_s25  ;;  %2074 = vmatmul.mubr.msk.f32.gmra.mxu0 %vm1531_vm11, %v1494_v55  ;;  %v1155_v61 = vrot.slane %v249_v45, 2 }
 0x200   : > { %v909_v35 = vpop.permute.xlu1 %908 }
 0x201   : > { %v877_v32 = vpop.permute.xlu0 %876  ;;  %v1413_v54 = vsel %vm1387_vm7, %v1380_v46, %v909_v35 }
 0x202   : > { %1018 = vrot.lane.b32.xlu1 %v249_v45, %s2204_s25  ;;  %v1397_v12 = vsel %vm1387_vm7, %v1364_v59, %v877_v32  ;;  %v4314_v32 = vld [vmem:[#allocation14_spill] sm:$0xff] }
 0x203   : > { %986 = vrot.lane.b32.xlu0 %v3587_v37, %s2204_s25  ;;  %v1156_v37 = vsel %vm476_vm1, %v1154_v1, %v1155_v61 }
 0x204   : > { %v1005_v20 = vpop.permute.xlu1 %1004 }
 0x205   : > { %v973_v57 = vpop.permute.xlu0 %972  ;;  %v1445_v27 = vsel %vm1420_vm8, %v1412_v24, %v1005_v20 }
 0x206   : > { %1118 = vrot.lane.b32.xlu1 %v1055_v31, %s2205_s30 }
 0x207   : > { %1086 = vrot.lane.b32.xlu0 %v4238_v40, %s2205_s30  ;;  %v1158_v40 = vsel %vm476_vm1, %v1155_v61, %v1157_v42  ;;  %v4317_v42 = vld [vmem:[#allocation4_spill] sm:$0xff] }
 0x208   : > { %v1007_v28 = vpop.permute.xlu1 %1006 }
 0x209   : > { %v975_v33 = vpop.permute.xlu0 %974  ;;  %v1446_v9 = vsel %vm1420_vm8, %v1413_v54, %v1007_v28 }
 0x20a   : > { %1120 = vrot.lane.b32.xlu1 %v1057_v62, %s2205_s30  ;;  %v1430_v3 = vsel %vm1420_vm8, %v1397_v12, %v975_v33  ;;  %v4315_v62 = vld [vmem:[#allocation9_spill] sm:$0xff] }
 0x20b   : > { %1088 = vrot.lane.b32.xlu0 %v4237_v48, %s2205_s30  ;;  %v1396_v48 = vsel %vm1387_vm7, %v1363_v17, %v875_v25 }
 0x20c   : > { %v1107_v15 = vpop.permute.xlu1 %1106  ;;  %v1429_v34 = vsel %vm1420_vm8, %v1396_v48, %v973_v57 }
 0x20d   : > { %v1075_v21 = vpop.permute.xlu0 %1074 }
 0x20e   : > { %1219 = vrot.lane.b32.xlu1 %v1156_v37, %s2206_s10  ;;  %v1462_v5 = vsel %vm1453_vm9, %v1429_v34, %v1075_v21  ;;  %v4316_v37 = vld [vmem:[#allocation30_spill] sm:$0xff] }
 0x20f   : > { %1187 = vrot.lane.b32.xlu0 %v2719_v18, %s2206_s10 }
 0x210   : > { %v1077_v29 = vpop.permute.xlu1 %1076 }
 0x211   : > { %v810_v53 = vpop.permute.xlu0 %809  ;;  %v1463_v0 = vsel %vm1453_vm9, %v1430_v3, %v1077_v29 }
 0x212   : > { %1221 = vrot.lane.b32.xlu1 %v1158_v40, %s2206_s10  ;;  %v1381_v31 = vsel %vm1354_vm6, %v4314_v32, %v810_v53 }
 0x213   : > { %1189 = vrot.lane.b32.xlu0 %v2714_v7, %s2206_s10  ;;  %v1478_v7 = vsel %vm1453_vm9, %v1445_v27, %v1107_v15  ;;  %v1366_v15 = vsel %vm1354_vm6, %v4317_v42, %v4316_v37 }
 0x214   : > { %v1176_v18 = vpop.permute.xlu1 %1175 }
 0x215   : > { %v1495_v30 = vsel %vm1486_vm10, %v1462_v5, %v1176_v18  ;;  %v1109_v47 = vpop.permute.xlu0 %1108 }
 0x216   : > { %2076 = vmatprep.mubr.msk.f32.mxu0 %vm1531_vm11, %v1495_v30  ;;  %v1479_v60 = vsel %vm1453_vm9, %v1446_v9, %v1109_v47 }
 0x218   : > { %v812_v8 = vpop.permute.xlu1 %811 }
 0x219   : > { %v1208_v10 = vpop.permute.xlu0 %1207  ;;  %v1382_v28 = vsel %vm1354_vm6, %v4315_v62, %v812_v8 }
 0x21a   : > { %v1511_v2 = vsel %vm1486_vm10, %v1478_v7, %v1208_v10  ;;  %v3872_v7 = vld [vmem:[%s4048_s2] ss:$0 sm:$0xff] }
 0x21b   : > { %2100 = vmatprep.mubr.msk.f32.mxu1 %vm1531_vm11, %v1511_v2 }
 0x21c   : > { %v911_v63 = vpop.permute.xlu1 %910 }
 0x21d   : > { %v879_v4 = vpop.permute.xlu0 %878  ;;  %v1414_v19 = vsel %vm1387_vm7, %v1381_v31, %v911_v63  ;;  %v4322_v31 = vld [vmem:[#allocation16_spill] sm:$0xff] }
 0x21e   : > { %v1398_v49 = vsel %vm1387_vm7, %v1365_v43, %v879_v4 }
 0x220   : > { %v1210_v25 = vpop.permute.xlu1 %1209 }
 0x221   : > { %v1512_v41 = vsel %vm1486_vm10, %v1479_v60, %v1210_v25  ;;  %v1178_v56 = vpop.permute.xlu0 %1177 }
 0x222   : > { %v1496_v6 = vsel %vm1486_vm10, %v1463_v0, %v1178_v56  ;;  %2101 = vmatmul.mubr.msk.f32.gmra.mxu1 %vm1531_vm11, %v1512_v41  ;;  %v4318_v0 = vld [vmem:[#allocation44_spill] sm:$0xff]  ;;  %v4319_v41 = vld [vmem:[#allocation6_spill] sm:$0xff] }
 0x223   : > { %2077 = vmatmul.mubr.msk.f32.gmra.mxu0 %vm1531_vm11, %v1496_v6  ;;  %v1367_v56 = vsel %vm1354_vm6, %v4319_v41, %v4318_v0  ;;  %v4327_v41 = vld [vmem:[#allocation2_spill] sm:$0xff] }
 0x224   : > { %v913_v51 = vpop.permute.xlu1 %912 }
 0x225   : > { %v881_v26 = vpop.permute.xlu0 %880  ;;  %v1415_v21 = vsel %vm1387_vm7, %v1382_v28, %v913_v51 }
 0x226   : > { %v1399_v40 = vsel %vm1387_vm7, %v1366_v15, %v881_v26 }
 0x228   : > { %v1009_v38 = vpop.permute.xlu1 %1008 }
 0x229   : > { %v977_v23 = vpop.permute.xlu0 %976  ;;  %v1447_v39 = vsel %vm1420_vm8, %v1414_v19, %v1009_v38  ;;  %v4323_v19 = vld [vmem:[#allocation5_spill] sm:$0xff] }
 0x22a   : > { %v1431_v55 = vsel %vm1420_vm8, %v1398_v49, %v977_v23 }
 0x22c   : > { %v1011_v44 = vpop.permute.xlu1 %1010 }
 0x22d   : > { %v979_v14 = vpop.permute.xlu0 %978  ;;  %v1448_v29 = vsel %vm1420_vm8, %v1415_v21, %v1011_v44 }
 0x22e   : > { %v1432_v17 = vsel %vm1420_vm8, %v1399_v40, %v979_v14 }
 0x230   : > { %v1111_v11 = vpop.permute.xlu1 %1110 }
 0x231   : > { %v1079_v52 = vpop.permute.xlu0 %1078  ;;  %v1480_v20 = vsel %vm1453_vm9, %v1447_v39, %v1111_v11  ;;  %v4320_v11 = vld [vmem:[#allocation24_spill] sm:$0xff]  ;;  %v1368_v39 = vsel %vm1354_vm6, %v4323_v19, %v4322_v31 }
 0x232   : > { %v1464_v16 = vsel %vm1453_vm9, %v1431_v55, %v1079_v52 }
 0x234   : > { %v1081_v45 = vpop.permute.xlu1 %1080 }
 0x235   : > { %v3837_v50 = vpop.permute.xlu0 %813  ;;  %v1465_v34 = vsel %vm1453_vm9, %v1432_v17, %v1081_v45 }
 0x236   : > { %v1383_v52 = vsel %vm1354_vm6, %v4320_v11, %v3837_v50 }
 0x238   : > { %v1180_v36 = vpop.permute.xlu1 %1179 }
 0x239   : > { %v1497_v35 = vsel %vm1486_vm10, %v1464_v16, %v1180_v36  ;;  %v1113_v13 = vpop.permute.xlu0 %1112 }
 0x23a   : > { %2079 = vmatprep.mubr.msk.f32.mxu0 %vm1531_vm11, %v1497_v35  ;;  %v1481_v53 = vsel %vm1453_vm9, %v1448_v29, %v1113_v13  ;;  %v4321_v13 = vld [vmem:[#allocation15_spill] sm:$0xff] }
 0x23c   : > { %v3848_v22 = vpop.permute.xlu1 %815 }
 0x23d   : > { %v1212_v57 = vpop.permute.xlu0 %1211  ;;  %v1384_v32 = vsel %vm1354_vm6, %v4321_v13, %v3848_v22 }
 0x23e   : > { %v1513_v1 = vsel %vm1486_vm10, %v1480_v20, %v1212_v57 }
 0x23f   : > { %2103 = vmatprep.mubr.msk.f32.mxu1 %vm1531_vm11, %v1513_v1 }
 0x240   : > { %v915_v61 = vpop.permute.xlu1 %914 }
 0x241   : > { %v883_v33 = vpop.permute.xlu0 %882  ;;  %v1416_v45 = vsel %vm1387_vm7, %v1383_v52, %v915_v61 }
 0x242   : > { %v1400_v51 = vsel %vm1387_vm7, %v1367_v56, %v883_v33 }
 0x244   : > { %v1214_v48 = vpop.permute.xlu1 %1213 }
 0x245   : > { %v1514_v5 = vsel %vm1486_vm10, %v1481_v53, %v1214_v48  ;;  %v1182_v18 = vpop.permute.xlu0 %1181 }
 0x246   : > { %v1498_v30 = vsel %vm1486_vm10, %v1465_v34, %v1182_v18  ;;  %2104 = vmatmul.mubr.msk.f32.gmra.mxu1 %vm1531_vm11, %v1514_v5 }
 0x247   : > { %2080 = vmatmul.mubr.msk.f32.gmra.mxu0 %vm1531_vm11, %v1498_v30 }
 0x248   : > { %v917_v47 = vpop.permute.xlu1 %916 }
 0x249   : > { %v885_v58 = vpop.permute.xlu0 %884  ;;  %v1417_v20 = vsel %vm1387_vm7, %v1384_v32, %v917_v47 }
 0x24a   : > { %v1401_v57 = vsel %vm1387_vm7, %v1368_v39, %v885_v58 }
 0x24c   : > { %v1013_v24 = vpop.permute.xlu1 %1012 }
 0x24d   : > { %v981_v27 = vpop.permute.xlu0 %980  ;;  %v1449_v43 = vsel %vm1420_vm8, %v1416_v45, %v1013_v24 }
 0x24e   : > { %v1433_v26 = vsel %vm1420_vm8, %v1400_v51, %v981_v27 }
 0x250   : > { %v1015_v8 = vpop.permute.xlu1 %1014 }
 0x251   : > { %v983_v10 = vpop.permute.xlu0 %982  ;;  %v1450_v1 = vsel %vm1420_vm8, %v1417_v20, %v1015_v8 }
 0x252   : > { %v2090_v2 = vpop.f32.mrf.mxu1  ;;  %v1434_v61 = vsel %vm1420_vm8, %v1401_v57, %v983_v10 }
 0x253   : > { %v2066_v63 = vpop.f32.mrf.mxu0  ;;  %v1784_v46 = vadd.f32 %v2090_v2, %v3872_v7  ;;  %v4324_v2 = vld [vmem:[#allocation17_spill] sm:$0xff] }
 0x254   : > { %v1704_v4 = vadd.f32 %v2066_v63, %v3872_v7  ;;  %v1115_v59 = vpop.permute.xlu1 %1114  ;;  %v1778_v54 = vpop.f32.mrf.mxu1 }
 0x255   : > { %1874 = vst.msk [vmem:[%s3877_s20 + $0x88] sm:$0xff] %vm1354_vm6, %v1784_v46  ;;  %v1698_v12 = vpop.f32.mrf.mxu0  ;;  %v1779_v9 = vadd.f32 %v3872_v7, %v1778_v54  ;;  %v1083_v3 = vpop.permute.xlu0 %1082  ;;  %v1482_v55 = vsel %vm1453_vm9, %v1449_v43, %v1115_v59  ;;  %v4326_v59 = vld [vmem:[#allocation8_spill] sm:$0xff] }
 0x256   : > { %1858 = vst.msk [vmem:[%s3877_s20 + $0x8] sm:$0xff] %vm1354_vm6, %v1704_v4  ;;  %v1699_v60 = vadd.f32 %v3872_v7, %v1698_v12  ;;  %v1466_v38 = vsel %vm1453_vm9, %v1433_v26, %v1083_v3  ;;  %v4325_v4 = vld [vmem:[#allocation29_spill] sm:$0xff] }
 0x257   : > { %1873 = vst.msk [vmem:[%s3877_s20 + $0x80] sm:$0xff] %vm1354_vm6, %v1779_v9  ;;  %v1369_v54 = vsel %vm1354_vm6, %v4326_v59, %v4325_v4 }
 0x258   : > { %1857 = vst.msk [vmem:[%s3877_s20] sm:$0xff] %vm1354_vm6, %v1699_v60  ;;  %v1085_v25 = vpop.permute.xlu1 %1084 }
 0x259   : > { %v818_v6 = vpop.permute.xlu0 %817  ;;  %v1467_v33 = vsel %vm1453_vm9, %v1434_v61, %v1085_v25 }
 0x25a   : > { %v1385_v63 = vsel %vm1354_vm6, %v4324_v2, %v818_v6 }
 0x25c   : > { %v1184_v23 = vpop.permute.xlu1 %1183 }
 0x25d   : > { %v1499_v44 = vsel %vm1486_vm10, %v1466_v38, %v1184_v23  ;;  %v1117_v14 = vpop.permute.xlu0 %1116  ;;  %v4328_v38 = vld [vmem:[#allocation43_spill] sm:$0xff] }
 0x25e   : > { %2082 = vmatprep.mubr.msk.f32.mxu0 %vm1531_vm11, %v1499_v44  ;;  %v1483_v62 = vsel %vm1453_vm9, %v1450_v1, %v1117_v14  ;;  %v4329_v23 = vld [vmem:[#allocation7_spill] sm:$0xff] }
 0x25f   : > { %v1370_v44 = vsel %vm1354_vm6, %v4329_v23, %v4328_v38 }
 0x260   : > { %v820_v49 = vpop.permute.xlu1 %819 }
 0x261   : > { %v1216_v16 = vpop.permute.xlu0 %1215  ;;  %v1386_v56 = vsel %vm1354_vm6, %v4327_v41, %v820_v49 }
 0x262   : > { %v1515_v36 = vsel %vm1486_vm10, %v1482_v55, %v1216_v16 }
 0x263   : > { %2106 = vmatprep.mubr.msk.f32.mxu1 %vm1531_vm11, %v1515_v36 }
 0x264   : > { %v919_v35 = vpop.permute.xlu1 %918 }
 0x265   : > { %v887_v50 = vpop.permute.xlu0 %886  ;;  %v1418_v12 = vsel %vm1387_vm7, %v1385_v63, %v919_v35 }
 0x266   : > { %v1402_v9 = vsel %vm1387_vm7, %v1369_v54, %v887_v50 }
 0x268   : > { %v1218_v28 = vpop.permute.xlu1 %1217 }
 0x269   : > { %v1516_v22 = vsel %vm1486_vm10, %v1483_v62, %v1218_v28  ;;  %v1186_v37 = vpop.permute.xlu0 %1185 }
 0x26a   : > { %v1500_v42 = vsel %vm1486_vm10, %v1467_v33, %v1186_v37  ;;  %2107 = vmatmul.mubr.msk.f32.gmra.mxu1 %vm1531_vm11, %v1516_v22 }
 0x26b   : > { %2083 = vmatmul.mubr.msk.f32.gmra.mxu0 %vm1531_vm11, %v1500_v42 }
 0x26c   : > { %v921_v15 = vpop.permute.xlu1 %920 }
 0x26d   : > { %v889_v21 = vpop.permute.xlu0 %888  ;;  %v1419_v14 = vsel %vm1387_vm7, %v1386_v56, %v921_v15 }
 0x26e   : > { %v1403_v52 = vsel %vm1387_vm7, %v1370_v44, %v889_v21 }
 0x270   : > { %v1017_v40 = vpop.permute.xlu1 %1016 }
 0x271   : > { %v985_v29 = vpop.permute.xlu0 %984  ;;  %v1451_v3 = vsel %vm1420_vm8, %v1418_v12, %v1017_v40 }
 0x272   : > { %v1435_v60 = vsel %vm1420_vm8, %v1402_v9, %v985_v29 }
 0x274   : > { %v1019_v17 = vpop.permute.xlu1 %1018 }
 0x275   : > { %v987_v53 = vpop.permute.xlu0 %986  ;;  %v1452_v45 = vsel %vm1420_vm8, %v1419_v14, %v1019_v17 }
 0x276   : > { %v2093_v48 = vpop.f32.mrf.mxu1  ;;  %v1436_v43 = vsel %vm1420_vm8, %v1403_v52, %v987_v53 }
 0x277   : > { %v2069_v34 = vpop.f32.mrf.mxu0  ;;  %v1794_v5 = vadd.f32 %v2093_v48, %v3872_v7 }
 0x278   : > { %v1714_v18 = vadd.f32 %v2069_v34, %v3872_v7  ;;  %v1119_v30 = vpop.permute.xlu1 %1118  ;;  %v1788_v47 = vpop.f32.mrf.mxu1 }
 0x279   : > { %1876 = vst.msk [vmem:[%s3877_s20 + $0x98] sm:$0xff] %vm1354_vm6, %v1794_v5  ;;  %v1708_v58 = vpop.f32.mrf.mxu0  ;;  %v1789_v24 = vadd.f32 %v3872_v7, %v1788_v47  ;;  %v1087_v27 = vpop.permute.xlu0 %1086  ;;  %v1484_v25 = vsel %vm1453_vm9, %v1451_v3, %v1119_v30 }
 0x27a   : > { %1860 = vst.msk [vmem:[%s3877_s20 + $0x18] sm:$0xff] %vm1354_vm6, %v1714_v18  ;;  %v1709_v8 = vadd.f32 %v3872_v7, %v1708_v58  ;;  %v1468_v6 = vsel %vm1453_vm9, %v1435_v60, %v1087_v27 }
 0x27b   : > { %1875 = vst.msk [vmem:[%s3877_s20 + $0x90] sm:$0xff] %vm1354_vm6, %v1789_v24 }
 0x27c   : > { %1859 = vst.msk [vmem:[%s3877_s20 + $0x10] sm:$0xff] %vm1354_vm6, %v1709_v8  ;;  %v1121_v10 = vpop.permute.xlu1 %1120 }
 0x27d   : > { %v1089_v46 = vpop.permute.xlu0 %1088  ;;  %v1485_v49 = vsel %vm1453_vm9, %v1452_v45, %v1121_v10 }
 0x27e   : > { %v1469_v16 = vsel %vm1453_vm9, %v1436_v43, %v1089_v46 }
 0x280   : > { %v1220_v0 = vpop.permute.xlu1 %1219 }
 0x281   : > { %v1517_v51 = vsel %vm1486_vm10, %v1484_v25, %v1220_v0  ;;  %v1188_v26 = vpop.permute.xlu0 %1187 }
 0x282   : > { %v1501_v11 = vsel %vm1486_vm10, %v1468_v6, %v1188_v26  ;;  %2109 = vmatprep.mubr.msk.f32.mxu1 %vm1531_vm11, %v1517_v51 }
 0x283   : > { %2085 = vmatprep.mubr.msk.f32.mxu0 %vm1531_vm11, %v1501_v11 }
 0x284   : > { %v1222_v55 = vpop.permute.xlu1 %1221 }
 0x285   : > { %v1518_v36 = vsel %vm1486_vm10, %v1485_v49, %v1222_v55  ;;  %v1190_v35 = vpop.permute.xlu0 %1189 }
 0x286   : > { %v1502_v13 = vsel %vm1486_vm10, %v1469_v16, %v1190_v35  ;;  %2110 = vmatmul.mubr.msk.f32.gmra.mxu1 %vm1531_vm11, %v1518_v36 }
 0x287   : > { %2086 = vmatmul.mubr.msk.f32.gmra.mxu0 %vm1531_vm11, %v1502_v13 }
 0x29a   : > { %v2096_v32 = vpop.f32.mrf.mxu1 }
 0x29b   : > { %v2072_v50 = vpop.f32.mrf.mxu0  ;;  %v1804_v31 = vadd.f32 %v2096_v32, %v3872_v7 }
 0x29c   : > { %v1724_v19 = vadd.f32 %v2072_v50, %v3872_v7  ;;  %v1798_v39 = vpop.f32.mrf.mxu1 }
 0x29d   : > { %1878 = vst.msk [vmem:[%s3877_s20 + $0xa8] sm:$0xff] %vm1354_vm6, %v1804_v31  ;;  %v1718_v20 = vpop.f32.mrf.mxu0  ;;  %v1799_v57 = vadd.f32 %v3872_v7, %v1798_v39 }
 0x29e   : > { %1862 = vst.msk [vmem:[%s3877_s20 + $0x28] sm:$0xff] %vm1354_vm6, %v1724_v19  ;;  %v1719_v1 = vadd.f32 %v3872_v7, %v1718_v20 }
 0x29f   : > { %1877 = vst.msk [vmem:[%s3877_s20 + $0xa0] sm:$0xff] %vm1354_vm6, %v1799_v57 }
 0x2a0   : > { %1861 = vst.msk [vmem:[%s3877_s20 + $0x20] sm:$0xff] %vm1354_vm6, %v1719_v1 }
 0x2be   : > { %v2099_v61 = vpop.f32.mrf.mxu1 }
 0x2bf   : > { %v2075_v62 = vpop.f32.mrf.mxu0  ;;  %v1814_v28 = vadd.f32 %v2099_v61, %v3872_v7 }
 0x2c0   : > { %v1734_v33 = vadd.f32 %v2075_v62, %v3872_v7  ;;  %v1808_v22 = vpop.f32.mrf.mxu1 }
 0x2c1   : > { %1880 = vst.msk [vmem:[%s3877_s20 + $0xb8] sm:$0xff] %vm1354_vm6, %v1814_v28  ;;  %v1728_v37 = vpop.f32.mrf.mxu0  ;;  %v1809_v42 = vadd.f32 %v3872_v7, %v1808_v22 }
 0x2c2   : > { %1864 = vst.msk [vmem:[%s3877_s20 + $0x38] sm:$0xff] %vm1354_vm6, %v1734_v33  ;;  %v1729_v15 = vadd.f32 %v3872_v7, %v1728_v37 }
 0x2c3   : > { %1879 = vst.msk [vmem:[%s3877_s20 + $0xb0] sm:$0xff] %vm1354_vm6, %v1809_v42 }
 0x2c4   : > { %1863 = vst.msk [vmem:[%s3877_s20 + $0x30] sm:$0xff] %vm1354_vm6, %v1729_v15 }
 0x2e2   : > { %v2102_v21 = vpop.f32.mrf.mxu1 }
 0x2e3   : > { %v2078_v40 = vpop.f32.mrf.mxu0  ;;  %v1824_v29 = vadd.f32 %v2102_v21, %v3872_v7 }
 0x2e4   : > { %v1744_v17 = vadd.f32 %v2078_v40, %v3872_v7  ;;  %v1818_v53 = vpop.f32.mrf.mxu1 }
 0x2e5   : > { %1882 = vst.msk [vmem:[%s3877_s20 + $0xc8] sm:$0xff] %vm1354_vm6, %v1824_v29  ;;  %v1738_v48 = vpop.f32.mrf.mxu0  ;;  %v1819_v34 = vadd.f32 %v3872_v7, %v1818_v53 }
 0x2e6   : > { %1866 = vst.msk [vmem:[%s3877_s20 + $0x48] sm:$0xff] %vm1354_vm6, %v1744_v17  ;;  %v1739_v5 = vadd.f32 %v3872_v7, %v1738_v48 }
 0x2e7   : > { %1881 = vst.msk [vmem:[%s3877_s20 + $0xc0] sm:$0xff] %vm1354_vm6, %v1819_v34 }
 0x2e8   : > { %1865 = vst.msk [vmem:[%s3877_s20 + $0x40] sm:$0xff] %vm1354_vm6, %v1739_v5 }
 0x306   : > { %v2105_v18 = vpop.f32.mrf.mxu1 }
 0x307   : > { %v2081_v30 = vpop.f32.mrf.mxu0  ;;  %v1834_v47 = vadd.f32 %v2105_v18, %v3872_v7 }
 0x308   : > { %v1754_v58 = vadd.f32 %v2081_v30, %v3872_v7  ;;  %v1828_v24 = vpop.f32.mrf.mxu1 }
 0x309   : > { %1884 = vst.msk [vmem:[%s3877_s20 + $0xd8] sm:$0xff] %vm1354_vm6, %v1834_v47  ;;  %v1748_v27 = vpop.f32.mrf.mxu0  ;;  %v1829_v8 = vadd.f32 %v3872_v7, %v1828_v24 }
 0x30a   : > { %1868 = vst.msk [vmem:[%s3877_s20 + $0x58] sm:$0xff] %vm1354_vm6, %v1754_v58  ;;  %v1749_v10 = vadd.f32 %v3872_v7, %v1748_v27 }
 0x30b   : > { %1883 = vst.msk [vmem:[%s3877_s20 + $0xd0] sm:$0xff] %vm1354_vm6, %v1829_v8 }
 0x30c   : > { %1867 = vst.msk [vmem:[%s3877_s20 + $0x50] sm:$0xff] %vm1354_vm6, %v1749_v10 }
 0x32a   : > { %v2108_v2 = vpop.f32.mrf.mxu1 }
 0x32b   : > { %v2084_v63 = vpop.f32.mrf.mxu0  ;;  %v1844_v46 = vadd.f32 %v2108_v2, %v3872_v7 }
 0x32c   : > { %v1764_v4 = vadd.f32 %v2084_v63, %v3872_v7  ;;  %v1838_v59 = vpop.f32.mrf.mxu1 }
 0x32d   : > { %1886 = vst.msk [vmem:[%s3877_s20 + $0xe8] sm:$0xff] %vm1354_vm6, %v1844_v46  ;;  %v1758_v54 = vpop.f32.mrf.mxu0  ;;  %v1839_v12 = vadd.f32 %v3872_v7, %v1838_v59 }
 0x32e   : > { %1870 = vst.msk [vmem:[%s3877_s20 + $0x68] sm:$0xff] %vm1354_vm6, %v1764_v4  ;;  %v1759_v9 = vadd.f32 %v3872_v7, %v1758_v54 }
 0x32f   : > { %1885 = vst.msk [vmem:[%s3877_s20 + $0xe0] sm:$0xff] %vm1354_vm6, %v1839_v12 }
 0x330   : > { %1869 = vst.msk [vmem:[%s3877_s20 + $0x60] sm:$0xff] %vm1354_vm6, %v1759_v9 }
 0x346   : > { %v2111_v3 = vpop.f32.mrf.mxu1 }
 0x347   : > { %v2087_v60 = vpop.f32.mrf.mxu0  ;;  %v1854_v25 = vadd.f32 %v2111_v3, %v3872_v7 }
 0x348   : > { %v1774_v0 = vadd.f32 %v2087_v60, %v3872_v7  ;;  %v1848_v41 = vpop.f32.mrf.mxu1 }
 0x349   : > { %1888 = vst.msk [vmem:[%s3877_s20 + $0xf8] sm:$0xff] %vm1354_vm6, %v1854_v25  ;;  %v1768_v56 = vpop.f32.mrf.mxu0  ;;  %v1849_v6 = vadd.f32 %v3872_v7, %v1848_v41 }
 0x34a   : > { %1872 = vst.msk [vmem:[%s3877_s20 + $0x78] sm:$0xff] %vm1354_vm6, %v1774_v0  ;;  %v1769_v51 = vadd.f32 %v3872_v7, %v1768_v56 }
 0x34b   : > { %1887 = vst.msk [vmem:[%s3877_s20 + $0xf0] sm:$0xff] %vm1354_vm6, %v1849_v6 }
 0x34c   : > { %1871 = vst.msk [vmem:[%s3877_s20 + $0x70] sm:$0xff] %vm1354_vm6, %v1769_v51 }
 0x34d PF: > { %s13_s14 = sadd.s32 1, %s2197_s14   ;;  %s4330_s12 = smov %s2193_s13 }
 0x34e   : > { %p10_p5 = scmp.ge.s32.totalorder %s13_s14, 4   ;;  %s4331_s13 = smov %s4333_s15 }
 0x350   :  { %12 = sbr.rel (!%p10_p5) target bundleno = 2 (0x2), region = 63 }

</bundles_post_ra>
